<compile_context>
chip_gen: v7x
topology: tpu7x:2x2x1
jax: 0.10.0
libtpu: 0.0.40
codegen_flags: <defaults>
</compile_context>

<pallas_src>
import numpy as np
import jax
import jax.numpy as jnp
from jax.experimental import pallas as pl
from jax.experimental.pallas import tpu as pltpu


def _onehot(cond, dtype):
    # bool -> {0, 1} in the requested dtype (exact for bf16 / f32).
    return jnp.where(cond, 1.0, 0.0).astype(dtype)


def multihead_attention_forward(x, edge_index, batch, params, n_heads, h_dim,
                                num_graphs):
    """x: [N, f_in] f32; edge_index: [2, E] int (src, dest); batch: [N] graph ids."""
    n, f_in = x.shape
    e = edge_index.shape[1]
    hh = n_heads * h_dim                        # stacked head width (128 in the demo)
    b = num_graphs
    scale = 1.0 / float(np.sqrt(h_dim))
    f32, bf16 = jnp.float32, jnp.bfloat16

    src = edge_index[0].astype(jnp.int32)
    dest = edge_index[1].astype(jnp.int32)
    bsrc = batch.astype(jnp.int32)[src]         # graph id of each edge's source node

    # Lane-dense output slab: pad f_in up to a multiple of 128, slice back after.
    f_pad = max(128, -(-f_in // 128) * 128)
    wo_pad = jnp.zeros((hh, f_pad), f32).at[:, :f_in].set(params["wo"]).astype(bf16)
    bo_pad = jnp.zeros((1, f_pad), f32).at[:, :f_in].set(params["bo"])

    def kernel(x_ref, src_c_ref, dest_c_ref, dest_r_ref, bsrc_c_ref, bsrc_r_ref,
               wq_ref, bq_ref, wk_ref, bk_ref, wv_ref, bv_ref,
               wo_ref, bo_ref, out_ref):
        xb = x_ref[...]                                                  # [N, f_in] bf16

        # ---- fused all-heads Q/K/V projections (bf16 MXU, f32 accumulation) ----
        q = jnp.dot(xb, wq_ref[...], preferred_element_type=f32) + bq_ref[...]
        k = jnp.dot(xb, wk_ref[...], preferred_element_type=f32) + bk_ref[...]
        v = jnp.dot(xb, wv_ref[...], preferred_element_type=f32) + bv_ref[...]
        # q/k/v: [N, hh]

        # ---- per-edge gathers q[dest], k[src], v[src] as one-hot matmuls ----
        col_n = jax.lax.broadcasted_iota(jnp.int32, (e, n), 1)
        s_oh = _onehot(col_n == src_c_ref[...], bf16)                    # [E, N]
        d_oh = _onehot(col_n == dest_c_ref[...], bf16)                   # [E, N]
        qe = jnp.dot(d_oh, q.astype(bf16), preferred_element_type=f32)   # [E, hh]
        ke = jnp.dot(s_oh, k.astype(bf16), preferred_element_type=f32)   # [E, hh]
        ve = jnp.dot(s_oh, v.astype(bf16), preferred_element_type=f32)   # [E, hh]

        # ---- per-head scaled dot-product scores ----
        # Pool each head's h_dim columns with a 0/1 block matrix (exact, f32 matmul).
        cc = jax.lax.broadcasted_iota(jnp.int32, (hh, n_heads), 0)
        hc = jax.lax.broadcasted_iota(jnp.int32, (hh, n_heads), 1)
        pool = _onehot((cc >= hc * h_dim) & (cc < (hc + 1) * h_dim), f32)    # [hh, NH]
        scores = jnp.dot(qe * ke, pool, preferred_element_type=f32) * scale  # [E, NH]
        ex = jnp.exp(scores)                                                 # [E, NH]

        # ---- normalization over all edges sharing the same batch[src] ----
        g_row = _onehot(jax.lax.broadcasted_iota(jnp.int32, (b, e), 0)
                        == bsrc_r_ref[...], f32)                         # [B, E]
        g_col = _onehot(jax.lax.broadcasted_iota(jnp.int32, (e, b), 1)
                        == bsrc_c_ref[...], f32)                         # [E, B]
        den = jnp.dot(g_row, ex, preferred_element_type=f32)             # [B, NH]
        den_e = jnp.dot(g_col, den, preferred_element_type=f32)          # [E, NH]
        attn_w = ex / (den_e + 1e-6)                                     # [E, NH]

        # ---- broadcast head weights back over h_dim columns, weight V ----
        cc2 = jax.lax.broadcasted_iota(jnp.int32, (n_heads, hh), 1)
        hc2 = jax.lax.broadcasted_iota(jnp.int32, (n_heads, hh), 0)
        spread = _onehot((cc2 >= hc2 * h_dim) & (cc2 < (hc2 + 1) * h_dim), f32)  # [NH, hh]
        w_full = jnp.dot(attn_w, spread, preferred_element_type=f32)     # [E, hh]
        vw = (w_full * ve).astype(bf16)                                  # [E, hh]

        # ---- scatter_add(a*v, dest) via transposed one-hot matmul ----
        dt_oh = _onehot(jax.lax.broadcasted_iota(jnp.int32, (n, e), 0)
                        == dest_r_ref[...], bf16)                        # [N, E]
        heads_cat = jnp.dot(dt_oh, vw, preferred_element_type=f32)       # [N, hh]

        # ---- final phi_x over concatenated heads, lane-padded store ----
        out_ref[...] = jnp.dot(heads_cat.astype(bf16), wo_ref[...],
                               preferred_element_type=f32) + bo_ref[...]

    args = (
        x.astype(bf16),                       # cast once in the wrapper
        src.reshape(e, 1), dest.reshape(e, 1), dest.reshape(1, e),
        bsrc.reshape(e, 1), bsrc.reshape(1, e),
        params["wq"].astype(bf16), params["bq"],
        params["wk"].astype(bf16), params["bk"],
        params["wv"].astype(bf16), params["bv"],
        wo_pad, bo_pad,
    )

    out_pad = pl.pallas_call(
        kernel,
        out_shape=jax.ShapeDtypeStruct((n, f_pad), f32),
        in_specs=[pl.BlockSpec(memory_space=pltpu.MemorySpace.VMEM)] * len(args),
        out_specs=pl.BlockSpec(memory_space=pltpu.MemorySpace.VMEM),
    )(*args)
    return out_pad[:, :f_in]


def init_params(key, f_in, n_heads, h_dim):
    """Stacked-head weights stored [in_features, out_features] (so y = x @ W + b).

    Columns [i*h_dim:(i+1)*h_dim] of wq/wk/wv are head i's phi_q/phi_k/phi_v, which
    matches the PyTorch ModuleList + torch.cat(dim=1) ordering exactly.
    """
    hh = n_heads * h_dim
    ks = jax.random.split(key, 8)

    def lin(kw, kb, fi, fo):
        w = jax.random.normal(kw, (fi, fo), jnp.float32) / jnp.sqrt(fi)
        bias = jax.random.normal(kb, (1, fo), jnp.float32) * 0.1
        return w, bias

    p = {}
    p["wq"], p["bq"] = lin(ks[0], ks[1], f_in, hh)
    p["wk"], p["bk"] = lin(ks[2], ks[3], f_in, hh)
    p["wv"], p["bv"] = lin(ks[4], ks[5], f_in, hh)
    p["wo"], p["bo"] = lin(ks[6], ks[7], hh, f_in)    # phi_x
    return p


def reference_forward(x, src, dest, batch, params, n_heads, h_dim, num_graphs,
                      mirror_bf16=False):
    """Plain-JAX reference of the PyTorch forward.

    mirror_bf16=False : exact f32 semantics of the module (take / segment_sum).
    mirror_bf16=True  : same math, but with matmul inputs rounded to bf16 at the same
                        points as the kernel (for a tight numerical comparison).
    """
    f32 = jnp.float32
    rnd = (lambda a: a.astype(jnp.bfloat16).astype(f32)) if mirror_bf16 else (lambda a: a)
    mm = lambda a, w: jnp.dot(rnd(a), rnd(w), preferred_element_type=f32)

    e = src.shape[0]
    scale = 1.0 / float(np.sqrt(h_dim))

    q = mm(x, params["wq"]) + params["bq"]
    k = mm(x, params["wk"]) + params["bk"]
    v = mm(x, params["wv"]) + params["bv"]
    qe, ke, ve = rnd(q)[dest], rnd(k)[src], rnd(v)[src]                 # [E, NH*H]

    scores = (qe * ke).reshape(e, n_heads, h_dim).sum(axis=-1) * scale  # [E, NH]
    ex = jnp.exp(scores)
    bsrc = batch[src]
    den = jax.ops.segment_sum(ex, bsrc, num_segments=num_graphs)        # [B, NH]
    a = ex / (den[bsrc] + 1e-6)                                         # [E, NH]

    vw = rnd(jnp.repeat(a, h_dim, axis=1) * ve)                         # [E, NH*H]
    heads_cat = jax.ops.segment_sum(vw, dest, num_segments=x.shape[0])  # [N, NH*H]
    return mm(heads_cat, params["wo"]) + params["bo"]                   # [N, f_in]


if __name__ == "__main__":
    # Small demo: 2 graphs x 8 nodes, fully connected within each graph -> E = 128.
    N, B = 16, 2
    F_IN, N_HEADS, H_DIM = 8, 4, 32            # n_heads * h_dim = 128 (lane-dense)

    npg = N // B
    src_np, dest_np = [], []
    for g in range(B):
        ids = np.arange(g * npg, (g + 1) * npg)
        s, d = np.meshgrid(ids, ids, indexing="ij")
        src_np.append(s.reshape(-1))
        dest_np.append(d.reshape(-1))
    src = jnp.asarray(np.concatenate(src_np), dtype=jnp.int32)          # [E]
    dest = jnp.asarray(np.concatenate(dest_np), dtype=jnp.int32)        # [E]
    edge_index = jnp.stack([src, dest])                                 # [2, 128]
    batch = jnp.asarray(np.repeat(np.arange(B), npg), dtype=jnp.int32)  # [N]

    key = jax.random.PRNGKey(0)
    kx, kp = jax.random.split(key)
    x = jax.random.normal(kx, (N, F_IN), jnp.float32)
    params = init_params(kp, F_IN, N_HEADS, H_DIM)

    out = multihead_attention_forward(x, edge_index, batch, params,
                                      N_HEADS, H_DIM, B)
    out = jax.block_until_ready(out)
    assert out.shape == (N, F_IN)

    # Tight check vs a reference that mirrors the kernel's bf16 matmul inputs.
    ref_mirror = reference_forward(x, src, dest, batch, params,
                                   N_HEADS, H_DIM, B, mirror_bf16=True)
    assert jnp.allclose(out, ref_mirror, atol=2e-3, rtol=2e-3), \
        float(jnp.max(jnp.abs(out - ref_mirror)))

    # Semantic check vs the exact f32 forward of the PyTorch module
    # (tolerance reflects the bf16 MXU fast path used inside the kernel).
    ref_f32 = reference_forward(x, src, dest, batch, params,
                                N_HEADS, H_DIM, B, mirror_bf16=False)
    assert jnp.allclose(out, ref_f32, atol=3e-2, rtol=3e-2), \
        float(jnp.max(jnp.abs(out - ref_f32)))

    print("KERNEL_OK")
</pallas_src>

<mosaic_0001>
module attributes {stable_mosaic.version = 11 : i64} {
  func.func @kernel(%arg0: memref<16x8xbf16, #tpu.memory_space<vmem>>, %arg1: memref<128x1xi32, #tpu.memory_space<vmem>>, %arg2: memref<128x1xi32, #tpu.memory_space<vmem>>, %arg3: memref<1x128xi32, #tpu.memory_space<vmem>>, %arg4: memref<128x1xi32, #tpu.memory_space<vmem>>, %arg5: memref<1x128xi32, #tpu.memory_space<vmem>>, %arg6: memref<8x128xbf16, #tpu.memory_space<vmem>>, %arg7: memref<1x128xf32, #tpu.memory_space<vmem>>, %arg8: memref<8x128xbf16, #tpu.memory_space<vmem>>, %arg9: memref<1x128xf32, #tpu.memory_space<vmem>>, %arg10: memref<8x128xbf16, #tpu.memory_space<vmem>>, %arg11: memref<1x128xf32, #tpu.memory_space<vmem>>, %arg12: memref<128x128xbf16, #tpu.memory_space<vmem>>, %arg13: memref<1x128xf32, #tpu.memory_space<vmem>>, %arg14: memref<16x128xf32, #tpu.memory_space<vmem>>) attributes {dimension_semantics = [], scalar_prefetch = 0 : i64, scratch_operands = 0 : i64, tpu.core_type = #tpu.core_type<tc>} {
    %c0 = arith.constant 0 : index
    %c0_0 = arith.constant 0 : index
    %0 = vector.load %arg0[%c0, %c0_0] : memref<16x8xbf16, #tpu.memory_space<vmem>>, vector<16x8xbf16>
    %c0_1 = arith.constant 0 : index
    %c0_2 = arith.constant 0 : index
    %1 = vector.load %arg6[%c0_1, %c0_2] : memref<8x128xbf16, #tpu.memory_space<vmem>>, vector<8x128xbf16>
    %cst = arith.constant dense<0.000000e+00> : vector<16x128xf32>
    %2 = tpu.matmul %0, %1, %cst {dimension_numbers = #tpu.dot_dimension_numbers<[1], [0], [0], [1], [0, 0, 1, 1], [], []>} : vector<16x8xbf16>, vector<8x128xbf16>, vector<16x128xf32> -> vector<16x128xf32>
    %c0_3 = arith.constant 0 : index
    %c0_4 = arith.constant 0 : index
    %3 = vector.load %arg7[%c0_3, %c0_4] : memref<1x128xf32, #tpu.memory_space<vmem>>, vector<1x128xf32>
    %4 = vector.broadcast %3 : vector<1x128xf32> to vector<16x128xf32>
    %5 = arith.addf %2, %4 : vector<16x128xf32>
    %c0_5 = arith.constant 0 : index
    %c0_6 = arith.constant 0 : index
    %6 = vector.load %arg8[%c0_5, %c0_6] : memref<8x128xbf16, #tpu.memory_space<vmem>>, vector<8x128xbf16>
    %cst_7 = arith.constant dense<0.000000e+00> : vector<16x128xf32>
    %7 = tpu.matmul %0, %6, %cst_7 {dimension_numbers = #tpu.dot_dimension_numbers<[1], [0], [0], [1], [0, 0, 1, 1], [], []>} : vector<16x8xbf16>, vector<8x128xbf16>, vector<16x128xf32> -> vector<16x128xf32>
    %c0_8 = arith.constant 0 : index
    %c0_9 = arith.constant 0 : index
    %8 = vector.load %arg9[%c0_8, %c0_9] : memref<1x128xf32, #tpu.memory_space<vmem>>, vector<1x128xf32>
    %9 = vector.broadcast %8 : vector<1x128xf32> to vector<16x128xf32>
    %10 = arith.addf %7, %9 : vector<16x128xf32>
    %c0_10 = arith.constant 0 : index
    %c0_11 = arith.constant 0 : index
    %11 = vector.load %arg10[%c0_10, %c0_11] : memref<8x128xbf16, #tpu.memory_space<vmem>>, vector<8x128xbf16>
    %cst_12 = arith.constant dense<0.000000e+00> : vector<16x128xf32>
    %12 = tpu.matmul %0, %11, %cst_12 {dimension_numbers = #tpu.dot_dimension_numbers<[1], [0], [0], [1], [0, 0, 1, 1], [], []>} : vector<16x8xbf16>, vector<8x128xbf16>, vector<16x128xf32> -> vector<16x128xf32>
    %c0_13 = arith.constant 0 : index
    %c0_14 = arith.constant 0 : index
    %13 = vector.load %arg11[%c0_13, %c0_14] : memref<1x128xf32, #tpu.memory_space<vmem>>, vector<1x128xf32>
    %14 = vector.broadcast %13 : vector<1x128xf32> to vector<16x128xf32>
    %15 = arith.addf %12, %14 : vector<16x128xf32>
    %16 = tpu.iota {dimensions = array<i32: 1>} : vector<128x16xi32>
    %c0_15 = arith.constant 0 : index
    %c0_16 = arith.constant 0 : index
    %17 = vector.load %arg1[%c0_15, %c0_16] : memref<128x1xi32, #tpu.memory_space<vmem>>, vector<128x1xi32>
    %18 = vector.broadcast %17 : vector<128x1xi32> to vector<128x16xi32>
    %19 = arith.cmpi eq, %16, %18 : vector<128x16xi32>
    %cst_17 = arith.constant 1.000000e+00 : f32
    %cst_18 = arith.constant 0.000000e+00 : f32
    %20 = vector.broadcast %cst_17 : f32 to vector<128x16xf32>
    %21 = vector.broadcast %cst_18 : f32 to vector<128x16xf32>
    %22 = arith.select %19, %20, %21 : vector<128x16xi1>, vector<128x16xf32>
    %23 = arith.truncf %22 : vector<128x16xf32> to vector<128x16xbf16>
    %c0_19 = arith.constant 0 : index
    %c0_20 = arith.constant 0 : index
    %24 = vector.load %arg2[%c0_19, %c0_20] : memref<128x1xi32, #tpu.memory_space<vmem>>, vector<128x1xi32>
    %25 = vector.broadcast %24 : vector<128x1xi32> to vector<128x16xi32>
    %26 = arith.cmpi eq, %16, %25 : vector<128x16xi32>
    %cst_21 = arith.constant 1.000000e+00 : f32
    %cst_22 = arith.constant 0.000000e+00 : f32
    %27 = vector.broadcast %cst_21 : f32 to vector<128x16xf32>
    %28 = vector.broadcast %cst_22 : f32 to vector<128x16xf32>
    %29 = arith.select %26, %27, %28 : vector<128x16xi1>, vector<128x16xf32>
    %30 = arith.truncf %29 : vector<128x16xf32> to vector<128x16xbf16>
    %31 = arith.truncf %5 : vector<16x128xf32> to vector<16x128xbf16>
    %cst_23 = arith.constant dense<0.000000e+00> : vector<128x128xf32>
    %32 = tpu.matmul %30, %31, %cst_23 {dimension_numbers = #tpu.dot_dimension_numbers<[1], [0], [0], [1], [0, 0, 1, 1], [], []>} : vector<128x16xbf16>, vector<16x128xbf16>, vector<128x128xf32> -> vector<128x128xf32>
    %33 = arith.truncf %10 : vector<16x128xf32> to vector<16x128xbf16>
    %cst_24 = arith.constant dense<0.000000e+00> : vector<128x128xf32>
    %34 = tpu.matmul %23, %33, %cst_24 {dimension_numbers = #tpu.dot_dimension_numbers<[1], [0], [0], [1], [0, 0, 1, 1], [], []>} : vector<128x16xbf16>, vector<16x128xbf16>, vector<128x128xf32> -> vector<128x128xf32>
    %35 = arith.truncf %15 : vector<16x128xf32> to vector<16x128xbf16>
    %cst_25 = arith.constant dense<0.000000e+00> : vector<128x128xf32>
    %36 = tpu.matmul %23, %35, %cst_25 {dimension_numbers = #tpu.dot_dimension_numbers<[1], [0], [0], [1], [0, 0, 1, 1], [], []>} : vector<128x16xbf16>, vector<16x128xbf16>, vector<128x128xf32> -> vector<128x128xf32>
    %37 = tpu.iota {dimensions = array<i32: 0>} : vector<128x4xi32>
    %38 = tpu.iota {dimensions = array<i32: 1>} : vector<128x4xi32>
    %c32_i32 = arith.constant 32 : i32
    %39 = vector.broadcast %c32_i32 : i32 to vector<128x4xi32>
    %40 = arith.muli %38, %39 : vector<128x4xi32>
    %41 = arith.cmpi sge, %37, %40 : vector<128x4xi32>
    %c1_i32 = arith.constant 1 : i32
    %42 = vector.broadcast %c1_i32 : i32 to vector<128x4xi32>
    %43 = arith.addi %38, %42 : vector<128x4xi32>
    %c32_i32_26 = arith.constant 32 : i32
    %44 = vector.broadcast %c32_i32_26 : i32 to vector<128x4xi32>
    %45 = arith.muli %43, %44 : vector<128x4xi32>
    %46 = arith.cmpi slt, %37, %45 : vector<128x4xi32>
    %47 = arith.andi %41, %46 : vector<128x4xi1>
    %cst_27 = arith.constant 1.000000e+00 : f32
    %cst_28 = arith.constant 0.000000e+00 : f32
    %48 = vector.broadcast %cst_27 : f32 to vector<128x4xf32>
    %49 = vector.broadcast %cst_28 : f32 to vector<128x4xf32>
    %50 = arith.select %47, %48, %49 : vector<128x4xi1>, vector<128x4xf32>
    %51 = arith.mulf %32, %34 : vector<128x128xf32>
    %cst_29 = arith.constant dense<0.000000e+00> : vector<128x4xf32>
    %52 = tpu.matmul %51, %50, %cst_29 {dimension_numbers = #tpu.dot_dimension_numbers<[1], [0], [0], [1], [0, 0, 1, 1], [], []>} : vector<128x128xf32>, vector<128x4xf32>, vector<128x4xf32> -> vector<128x4xf32>
    %cst_30 = arith.constant 0.176776692 : f32
    %53 = vector.broadcast %cst_30 : f32 to vector<128x4xf32>
    %54 = arith.mulf %52, %53 : vector<128x4xf32>
    %55 = math.exp %54 : vector<128x4xf32>
    %56 = tpu.iota {dimensions = array<i32: 0>} : vector<2x128xi32>
    %c0_31 = arith.constant 0 : index
    %c0_32 = arith.constant 0 : index
    %57 = vector.load %arg5[%c0_31, %c0_32] : memref<1x128xi32, #tpu.memory_space<vmem>>, vector<1x128xi32>
    %58 = vector.broadcast %57 : vector<1x128xi32> to vector<2x128xi32>
    %59 = arith.cmpi eq, %56, %58 : vector<2x128xi32>
    %cst_33 = arith.constant 1.000000e+00 : f32
    %cst_34 = arith.constant 0.000000e+00 : f32
    %60 = vector.broadcast %cst_33 : f32 to vector<2x128xf32>
    %61 = vector.broadcast %cst_34 : f32 to vector<2x128xf32>
    %62 = arith.select %59, %60, %61 : vector<2x128xi1>, vector<2x128xf32>
    %63 = tpu.iota {dimensions = array<i32: 1>} : vector<128x2xi32>
    %c0_35 = arith.constant 0 : index
    %c0_36 = arith.constant 0 : index
    %64 = vector.load %arg4[%c0_35, %c0_36] : memref<128x1xi32, #tpu.memory_space<vmem>>, vector<128x1xi32>
    %65 = vector.broadcast %64 : vector<128x1xi32> to vector<128x2xi32>
    %66 = arith.cmpi eq, %63, %65 : vector<128x2xi32>
    %cst_37 = arith.constant 1.000000e+00 : f32
    %cst_38 = arith.constant 0.000000e+00 : f32
    %67 = vector.broadcast %cst_37 : f32 to vector<128x2xf32>
    %68 = vector.broadcast %cst_38 : f32 to vector<128x2xf32>
    %69 = arith.select %66, %67, %68 : vector<128x2xi1>, vector<128x2xf32>
    %cst_39 = arith.constant dense<0.000000e+00> : vector<2x4xf32>
    %70 = tpu.matmul %62, %55, %cst_39 {dimension_numbers = #tpu.dot_dimension_numbers<[1], [0], [0], [1], [0, 0, 1, 1], [], []>} : vector<2x128xf32>, vector<128x4xf32>, vector<2x4xf32> -> vector<2x4xf32>
    %cst_40 = arith.constant dense<0.000000e+00> : vector<128x4xf32>
    %71 = tpu.matmul %69, %70, %cst_40 {dimension_numbers = #tpu.dot_dimension_numbers<[1], [0], [0], [1], [0, 0, 1, 1], [], []>} : vector<128x2xf32>, vector<2x4xf32>, vector<128x4xf32> -> vector<128x4xf32>
    %cst_41 = arith.constant 9.99999997E-7 : f32
    %72 = vector.broadcast %cst_41 : f32 to vector<128x4xf32>
    %73 = arith.addf %71, %72 : vector<128x4xf32>
    %74 = arith.divf %55, %73 : vector<128x4xf32>
    %75 = tpu.iota {dimensions = array<i32: 1>} : vector<4x128xi32>
    %76 = tpu.iota {dimensions = array<i32: 0>} : vector<4x128xi32>
    %c32_i32_42 = arith.constant 32 : i32
    %77 = vector.broadcast %c32_i32_42 : i32 to vector<4x128xi32>
    %78 = arith.muli %76, %77 : vector<4x128xi32>
    %79 = arith.cmpi sge, %75, %78 : vector<4x128xi32>
    %c1_i32_43 = arith.constant 1 : i32
    %80 = vector.broadcast %c1_i32_43 : i32 to vector<4x128xi32>
    %81 = arith.addi %76, %80 : vector<4x128xi32>
    %c32_i32_44 = arith.constant 32 : i32
    %82 = vector.broadcast %c32_i32_44 : i32 to vector<4x128xi32>
    %83 = arith.muli %81, %82 : vector<4x128xi32>
    %84 = arith.cmpi slt, %75, %83 : vector<4x128xi32>
    %85 = arith.andi %79, %84 : vector<4x128xi1>
    %cst_45 = arith.constant 1.000000e+00 : f32
    %cst_46 = arith.constant 0.000000e+00 : f32
    %86 = vector.broadcast %cst_45 : f32 to vector<4x128xf32>
    %87 = vector.broadcast %cst_46 : f32 to vector<4x128xf32>
    %88 = arith.select %85, %86, %87 : vector<4x128xi1>, vector<4x128xf32>
    %cst_47 = arith.constant dense<0.000000e+00> : vector<128x128xf32>
    %89 = tpu.matmul %74, %88, %cst_47 {dimension_numbers = #tpu.dot_dimension_numbers<[1], [0], [0], [1], [0, 0, 1, 1], [], []>} : vector<128x4xf32>, vector<4x128xf32>, vector<128x128xf32> -> vector<128x128xf32>
    %90 = arith.mulf %89, %36 : vector<128x128xf32>
    %91 = arith.truncf %90 : vector<128x128xf32> to vector<128x128xbf16>
    %92 = tpu.iota {dimensions = array<i32: 0>} : vector<16x128xi32>
    %c0_48 = arith.constant 0 : index
    %c0_49 = arith.constant 0 : index
    %93 = vector.load %arg3[%c0_48, %c0_49] : memref<1x128xi32, #tpu.memory_space<vmem>>, vector<1x128xi32>
    %94 = vector.broadcast %93 : vector<1x128xi32> to vector<16x128xi32>
    %95 = arith.cmpi eq, %92, %94 : vector<16x128xi32>
    %cst_50 = arith.constant 1.000000e+00 : f32
    %cst_51 = arith.constant 0.000000e+00 : f32
    %96 = vector.broadcast %cst_50 : f32 to vector<16x128xf32>
    %97 = vector.broadcast %cst_51 : f32 to vector<16x128xf32>
    %98 = arith.select %95, %96, %97 : vector<16x128xi1>, vector<16x128xf32>
    %99 = arith.truncf %98 : vector<16x128xf32> to vector<16x128xbf16>
    %cst_52 = arith.constant dense<0.000000e+00> : vector<16x128xf32>
    %100 = tpu.matmul %99, %91, %cst_52 {dimension_numbers = #tpu.dot_dimension_numbers<[1], [0], [0], [1], [0, 0, 1, 1], [], []>} : vector<16x128xbf16>, vector<128x128xbf16>, vector<16x128xf32> -> vector<16x128xf32>
    %101 = arith.truncf %100 : vector<16x128xf32> to vector<16x128xbf16>
    %c0_53 = arith.constant 0 : index
    %c0_54 = arith.constant 0 : index
    %102 = vector.load %arg12[%c0_53, %c0_54] : memref<128x128xbf16, #tpu.memory_space<vmem>>, vector<128x128xbf16>
    %cst_55 = arith.constant dense<0.000000e+00> : vector<16x128xf32>
    %103 = tpu.matmul %101, %102, %cst_55 {dimension_numbers = #tpu.dot_dimension_numbers<[1], [0], [0], [1], [0, 0, 1, 1], [], []>} : vector<16x128xbf16>, vector<128x128xbf16>, vector<16x128xf32> -> vector<16x128xf32>
    %c0_56 = arith.constant 0 : index
    %c0_57 = arith.constant 0 : index
    %104 = vector.load %arg13[%c0_56, %c0_57] : memref<1x128xf32, #tpu.memory_space<vmem>>, vector<1x128xf32>
    %105 = vector.broadcast %104 : vector<1x128xf32> to vector<16x128xf32>
    %106 = arith.addf %103, %105 : vector<16x128xf32>
    %c0_58 = arith.constant 0 : index
    %c0_59 = arith.constant 0 : index
    %107 = vector.load %arg14[%c0_58, %c0_59] : memref<16x128xf32, #tpu.memory_space<vmem>>, vector<16x128xf32>
    tpu.vector_store %arg14[%c0_58, %c0_59], %106 {strides = array<i32>} : memref<16x128xf32, #tpu.memory_space<vmem>>, vector<16x128xf32>,
    return
  }
}

</mosaic_0001>

<bundles_post_ra>
// kernel: tpu_custom_call.1
= control target key start
LH: loop header
LB: loop body
LE: loop exit
PB: predicated region body
PF: predicated region fallthrough
CT: control target
= control target key end

     0   :  { %v2524_v3 = vmov 0   ;;  %vm3568_vm0 = vcmask 1043456   ;;  %v2525_v5 = vmov 0.0   ;;  %vm64_vm1 = vcmask 64512   ;;  %s3553_s0 = inlined_call_operand.vmem [shape: bf16[16,8], index: 0, kind: input, shape index: {}]   ;;  %s3554_s1 = inlined_call_operand.vmem [shape: s32[128,1], index: 1, kind: input, shape index: {}]   ;;  %s3555_s2 = inlined_call_operand.vmem [shape: s32[128,1], index: 2, kind: input, shape index: {}]   ;;  %s3556_s3 = inlined_call_operand.vmem [shape: s32[1,128], index: 3, kind: input, shape index: {}]   ;;  %s3557_s4 = inlined_call_operand.vmem [shape: s32[128,1], index: 4, kind: input, shape index: {}]   ;;  %s3558_s5 = inlined_call_operand.vmem [shape: s32[1,128], index: 5, kind: input, shape index: {}]   ;;  %s3559_s6 = inlined_call_operand.vmem [shape: bf16[8,128], index: 6, kind: input, shape index: {}]   ;;  %s3560_s7 = inlined_call_operand.vmem [shape: f32[1,128], index: 7, kind: input, shape index: {}]   ;;  %s3561_s8 = inlined_call_operand.vmem [shape: bf16[8,128], index: 8, kind: input, shape index: {}]   ;;  %s3562_s9 = inlined_call_operand.vmem [shape: f32[1,128], index: 9, kind: input, shape index: {}]   ;;  %s3563_s10 = inlined_call_operand.vmem [shape: bf16[8,128], index: 10, kind: input, shape index: {}]   ;;  %s3564_s11 = inlined_call_operand.vmem [shape: f32[1,128], index: 11, kind: input, shape index: {}]   ;;  %s3565_s12 = inlined_call_operand.vmem [shape: bf16[128,128], index: 12, kind: input, shape index: {}]   ;;  %s3566_s13 = inlined_call_operand.vmem [shape: f32[1,128], index: 13, kind: input, shape index: {}]   ;;  %s3567_s14 = inlined_call_operand.hbm [shape: f32[16,128], index: 14, kind: output, shape index: {}]  }
   0x1   :  { %v323_v0 = vld [vmem:[%s3555_s2] sm:$0xff]  ;;  %2426 = vset.pattern.permute.xlu1 %v2524_v3  ;;  %2425 = vset.pattern.permute.xlu0 %v2524_v3  ;;  %vm3569_vm2 = vmmov 0   ;;  %v324_v9 = vld [vmem:[%s3555_s2 + $0x8] sm:$0xff]  ;;  %v222_v12 = vld [vmem:[%s3554_s1 + $0x18] sm:$0xff] }
   0x2   :  { %v219_v1 = vld [vmem:[%s3554_s1] sm:$0xff]  ;;  %2105 = vmatprep.subr.bf16.mxu0 %v2525_v5  ;;  %2111 = vmatprep.subr.bf16.mxu1 %v2525_v5  ;;  %v220_v10 = vld [vmem:[%s3554_s1 + $0x8] sm:$0xff]  ;;  %v221_v13 = vld [vmem:[%s3554_s1 + $0x10] sm:$0xff] }
   0x3   :  { %v51_v2 = vld [vmem:[%s3559_s6] sm:$0xf]  ;;  %340 = vperm.xlu1 %2426, %v323_v0   ;;  %236 = vperm.xlu0 %2425, %v219_v1   ;;  %v326_v15 = vld [vmem:[%s3555_s2 + $0x18] sm:$0xff]  ;;  %v325_v16 = vld [vmem:[%s3555_s2 + $0x10] sm:$0xff] }
   0x4   :  { %v113_v4 = vld [vmem:[%s3561_s8] sm:$0xf]  ;;  %v70_v6 = vsel %vm3568_vm0, %v51_v2, 0  ;;  %2107 = vmatprep.mubr.msk.bf16.mxu0 %vm3569_vm2, %v2525_v5  ;;  %2113 = vmatprep.mubr.msk.bf16.mxu1 %vm3569_vm2, %v2525_v5  ;;  %v224_v17 = vld [vmem:[%s3554_s1 + $0x28] sm:$0xff] }
   0x5   :  { %v122_v7 = vsel %vm3568_vm0, %v113_v4, 0  ;;  %v2427_v8 = vld [vmem:[%s3553_s0] sm:$0xff]   ;;  %2106 = vmatpush3.bf16.msra.mxu0 %v70_v6  ;;  %v328_v19 = vld [vmem:[%s3555_s2 + $0x28] sm:$0xff] }
   0x6   :  { %2112 = vmatpush3.bf16.msra.mxu1 %v122_v7  ;;  %2117 = vmatprep.subr.bf16.mxu0 %v2525_v5  ;;  %v165_v11 = vld [vmem:[%s3563_s10] sm:$0xf] }
   0x7   :  { %343 = vperm.xlu1 %2426, %v324_v9   ;;  %239 = vperm.xlu0 %2425, %v220_v10   ;;  %v174_v14 = vsel %vm3568_vm0, %v165_v11, 0  ;;  %v223_v18 = vld [vmem:[%s3554_s1 + $0x20] sm:$0xff] }
   0x8   :  { %2108 = vmatmul.mubr.msk.bf16.vlgmr.msra.gmra.mrb[0].mxu0 %vm64_vm1, %v2427_v8  ;;  %v327_v20 = vld [vmem:[%s3555_s2 + $0x20] sm:$0xff] }
   0x9   :  { %2114 = vmatmul.mubr.msk.bf16.vlgmr.msra.gmra.mrb[0].mxu1 %vm64_vm1, %v2427_v8  ;;  %2119 = vmatprep.mubr.msk.bf16.mxu0 %vm3569_vm2, %v2525_v5 }
   0xa   :  { %2118 = vmatpush3.bf16.msra.mxu0 %v174_v14 }
   0xb   :  { %245 = vperm.xlu1 %2426, %v222_v12   ;;  %242 = vperm.xlu0 %2425, %v221_v13  }
   0xf   :  { %349 = vperm.xlu1 %2426, %v326_v15   ;;  %346 = vperm.xlu0 %2425, %v325_v16  }
  0x10   :  { %2120 = vmatmul.mubr.msk.bf16.vlgmr.msra.gmra.mrb[4].mxu0 %vm64_vm1, %v2427_v8 }
  0x13   :  { %251 = vperm.xlu1 %2426, %v224_v17   ;;  %248 = vperm.xlu0 %2425, %v223_v18  }
  0x17   :  { %355 = vperm.xlu1 %2426, %v328_v19   ;;  %352 = vperm.xlu0 %2425, %v327_v20  }
  0x18   :  { %19 = vsyncpa [#allocation3], 0  ;;  %v226_v21 = vld [vmem:[%s3554_s1 + $0x38] sm:$0xff]  ;;  %v225_v22 = vld [vmem:[%s3554_s1 + $0x30] sm:$0xff]  ;;  %v217_v57 = vlaneseq  ;;  %vm3571_vm7 = vcmask 130048  }
  0x19   :  { %v330_v23 = vld [vmem:[%s3555_s2 + $0x38] sm:$0xff]  ;;  %v329_v24 = vld [vmem:[%s3555_s2 + $0x30] sm:$0xff]  ;;  %v228_v25 = vld [vmem:[%s3554_s1 + $0x48] sm:$0xff] }
  0x1a   :  { %v227_v26 = vld [vmem:[%s3554_s1 + $0x40] sm:$0xff]  ;;  %v332_v27 = vld [vmem:[%s3555_s2 + $0x48] sm:$0xff]  ;;  %v230_v29 = vld [vmem:[%s3554_s1 + $0x58] sm:$0xff]  ;;  %v2779_v58 = vand.u32 127, %v217_v57 }
  0x1b   :  { %257 = vperm.xlu1 %2426, %v226_v21   ;;  %254 = vperm.xlu0 %2425, %v225_v22   ;;  %v331_v28 = vld [vmem:[%s3555_s2 + $0x40] sm:$0xff]  ;;  %v229_v30 = vld [vmem:[%s3554_s1 + $0x50] sm:$0xff]  ;;  %v334_v31 = vld [vmem:[%s3555_s2 + $0x58] sm:$0xff] }
  0x1c   :  { %v333_v32 = vld [vmem:[%s3555_s2 + $0x50] sm:$0xff]  ;;  %v232_v33 = vld [vmem:[%s3554_s1 + $0x68] sm:$0xff]  ;;  %v231_v34 = vld [vmem:[%s3554_s1 + $0x60] sm:$0xff]  ;;  %v804_v22 = vadd.s32 1, %v2779_v58 }
  0x1d   :  { %v336_v35 = vld [vmem:[%s3555_s2 + $0x68] sm:$0xff]  ;;  %v335_v36 = vld [vmem:[%s3555_s2 + $0x60] sm:$0xff]  ;;  %v234_v37 = vld [vmem:[%s3554_s1 + $0x78] sm:$0xff] }
  0x1e   :  { %v233_v38 = vld [vmem:[%s3554_s1 + $0x70] sm:$0xff]  ;;  %v338_v39 = vld [vmem:[%s3555_s2 + $0x78] sm:$0xff]  ;;  %v1071_v41 = vld [vmem:[%s3557_s4 + $0x8] sm:$0xff] }
  0x1f   :  { %361 = vperm.xlu1 %2426, %v330_v23   ;;  %358 = vperm.xlu0 %2425, %v329_v24   ;;  %v337_v40 = vld [vmem:[%s3555_s2 + $0x70] sm:$0xff]  ;;  %v1070_v42 = vld [vmem:[%s3557_s4] sm:$0xff]  ;;  %v1073_v43 = vld [vmem:[%s3557_s4 + $0x18] sm:$0xff]  ;;  %v2811_v23 = vshrl.u32 %v217_v57, 7  ;;  %v2814_v24 = vmul.u32 32, %v2779_v58 }
  0x20   :  { %v1072_v44 = vld [vmem:[%s3557_s4 + $0x10] sm:$0xff]  ;;  %v1075_v45 = vld [vmem:[%s3557_s4 + $0x28] sm:$0xff]  ;;  %v1074_v46 = vld [vmem:[%s3557_s4 + $0x20] sm:$0xff] }
  0x21   :  { %v1077_v47 = vld [vmem:[%s3557_s4 + $0x38] sm:$0xff]  ;;  %v1076_v48 = vld [vmem:[%s3557_s4 + $0x30] sm:$0xff]  ;;  %v1079_v49 = vld [vmem:[%s3557_s4 + $0x48] sm:$0xff]  ;;  %vm788_vm1 = vcmp.ge.s32.totalorder %v2811_v23, %v2814_v24 }
  0x22   :  { %v1078_v50 = vld [vmem:[%s3557_s4 + $0x40] sm:$0xff]  ;;  %v1081_v51 = vld [vmem:[%s3557_s4 + $0x58] sm:$0xff]  ;;  %v1080_v52 = vld [vmem:[%s3557_s4 + $0x50] sm:$0xff] }
  0x23   :  { %263 = vperm.xlu1 %2426, %v228_v25   ;;  %260 = vperm.xlu0 %2425, %v227_v26   ;;  %v1083_v53 = vld [vmem:[%s3557_s4 + $0x68] sm:$0xff]  ;;  %v1082_v54 = vld [vmem:[%s3557_s4 + $0x60] sm:$0xff]  ;;  %v1085_v55 = vld [vmem:[%s3557_s4 + $0x78] sm:$0xff]  ;;  %v2816_v25 = vmul.u32 32, %v804_v22 }
  0x24   :  { %v1084_v56 = vld [vmem:[%s3557_s4 + $0x70] sm:$0xff]  ;;  %s2530_s4 = smov [#allocation2]  }
  0x25   :  { %s1865_s30 = sshll.u32 %s2530_s4, 4  ;;  %s1866_s30 = int_to_ptr.vmem [resolvable:$true] %s1865_s30 }
  0x26   :  { %p2505_p1 = scmp.lt.s32.totalorder %s1866_s30, %s1866_s30 }
  0x27   :  { %367 = vperm.xlu1 %2426, %v332_v27   ;;  %364 = vperm.xlu0 %2425, %v331_v28   ;;  %v2823_v28 = vadd.s32 8, %v2811_v23 }
  0x2b   :  { %269 = vperm.xlu1 %2426, %v230_v29   ;;  %266 = vperm.xlu0 %2425, %v229_v30   ;;  %v773_v29 = vadd.s32 16, %v2811_v23  ;;  %v774_v30 = vadd.s32 24, %v2811_v23 }
  0x2f   :  { %373 = vperm.xlu1 %2426, %v334_v31   ;;  %370 = vperm.xlu0 %2425, %v333_v32   ;;  %v1876_v32 = vld [vmem:[%s3560_s7] ss:$0 sm:$0xff] }
  0x33   :  { %275 = vperm.xlu1 %2426, %v232_v33   ;;  %272 = vperm.xlu0 %2425, %v231_v34  }
  0x37   :  { %379 = vperm.xlu1 %2426, %v336_v35   ;;  %376 = vperm.xlu0 %2425, %v335_v36  }
  0x3b   :  { %281 = vperm.xlu1 %2426, %v234_v37   ;;  %278 = vperm.xlu0 %2425, %v233_v38  }
  0x3f   :  { %385 = vperm.xlu1 %2426, %v338_v39   ;;  %382 = vperm.xlu0 %2425, %v337_v40  }
  0x43   :  { %1090 = vperm.xlu1 %2426, %v1071_v41   ;;  %1087 = vperm.xlu0 %2425, %v1070_v42   ;;  %v1879_v41 = vld [vmem:[%s3562_s9] ss:$0 sm:$0xff] }
  0x47   :  { %1096 = vperm.xlu1 %2426, %v1073_v43   ;;  %1093 = vperm.xlu0 %2425, %v1072_v44  }
  0x4b   :  { %1102 = vperm.xlu1 %2426, %v1075_v45   ;;  %1099 = vperm.xlu0 %2425, %v1074_v46  }
  0x4f   :  { %1108 = vperm.xlu1 %2426, %v1077_v47   ;;  %1105 = vperm.xlu0 %2425, %v1076_v48  }
  0x53   :  { %1114 = vperm.xlu1 %2426, %v1079_v49   ;;  %1111 = vperm.xlu0 %2425, %v1078_v50   ;;  %v775_v49 = vadd.s32 32, %v2811_v23 }
  0x55   :  { %vm810_vm0 = vcmp.lt.s32.totalorder %v775_v49, %v2816_v25 }
  0x57   :  { %1120 = vperm.xlu1 %2426, %v1081_v51   ;;  %1117 = vperm.xlu0 %2425, %v1080_v52  }
  0x5b   :  { %1126 = vperm.xlu1 %2426, %v1083_v53   ;;  %1123 = vperm.xlu0 %2425, %v1082_v54  }
  0x5f   :  { %1132 = vperm.xlu1 %2426, %v1085_v55   ;;  %1129 = vperm.xlu0 %2425, %v1084_v56  }
  0x82   :  { %v341_v59 = vpop.permute.xlu1 %340  ;;  %v237_v60 = vpop.permute.xlu0 %236 }
  0x83   :  { %vm387_vm3 = vcmp.eq.s32.totalorder %v2779_v58, %v341_v59  ;;  %vm283_vm4 = vcmp.eq.s32.totalorder %v2779_v58, %v237_v60 }
  0x84   :  { %v403_v61 = vsel %vm387_vm3, 1.0, %v2525_v5  ;;  %v299_v62 = vsel %vm283_vm4, 1.0, %v2525_v5  ;;  %vm806_vm3 = vcmp.lt.s32.totalorder %v2811_v23, %v2816_v25  ;;  %vm789_vm4 = vcmp.ge.s32.totalorder %v2823_v28, %v2814_v24 }
  0x86   :  { %v344_v63 = vpop.permute.xlu1 %343  ;;  %v240_v0 = vpop.permute.xlu0 %239 }
  0x87   :  { %vm388_vm5 = vcmp.eq.s32.totalorder %v2779_v58, %v344_v63  ;;  %vm284_vm6 = vcmp.eq.s32.totalorder %v2779_v58, %v240_v0 }
  0x88   :  { %v404_v1 = vsel %vm388_vm5, 1.0, %v2525_v5  ;;  %v300_v2 = vsel %vm284_vm6, 1.0, %v2525_v5  ;;  %vm807_vm5 = vcmp.lt.s32.totalorder %v2823_v28, %v2816_v25  ;;  %vm2876_vm6 = vmand %vm788_vm1, %vm806_vm3 }
  0x89   :  { %v419_v3 = vpack.c.bf16 %v404_v1, %v403_v61  ;;  %v2789_v4 = vpack.c.bf16 %v300_v2, %v299_v62  ;;  %v776_v62 = vadd.s32 40, %v2811_v23  ;;  %v1881_v2 = vld [vmem:[%s3564_s11] ss:$0 sm:$0xff] }
  0x8a   :  { %v246_v6 = vpop.permute.xlu1 %245  ;;  %v243_v7 = vpop.permute.xlu0 %242 }
  0x8b   :  { %2125 = vmatprep.mubr.msk.bf16.mxu1 %vm3571_vm7, %v419_v3  ;;  %2143 = vmatprep.mubr.msk.bf16.mxu0 %vm3571_vm7, %v2789_v4  ;;  %vm286_vm8 = vcmp.eq.s32.totalorder %v2779_v58, %v246_v6  ;;  %vm285_vm9 = vcmp.eq.s32.totalorder %v2779_v58, %v243_v7 }
  0x8c   :  { %v302_v31 = vsel %vm286_vm8, 1.0, %v2525_v5  ;;  %v301_v35 = vsel %vm285_vm9, 1.0, %v2525_v5  ;;  %vm2899_vm8 = vmand %vm789_vm4, %vm807_vm5  ;;  %vm790_vm9 = vcmp.ge.s32.totalorder %v773_v29, %v2814_v24 }
  0x8d   :  { %v2908_v59 = vpack.c.bf16 %v302_v31, %v301_v35 }
  0x8e   :  { %v350_v8 = vpop.permute.xlu1 %349  ;;  %v347_v9 = vpop.permute.xlu0 %346 }
  0x8f   :  { %vm390_vm10 = vcmp.eq.s32.totalorder %v2779_v58, %v350_v8  ;;  %vm389_vm11 = vcmp.eq.s32.totalorder %v2779_v58, %v347_v9 }
  0x90   :  { %v2853_v36 = vsel %vm390_vm10, 1.0, %v2525_v5  ;;  %v2858_v37 = vsel %vm389_vm11, 1.0, %v2525_v5  ;;  %vm791_vm10 = vcmp.ge.s32.totalorder %v774_v30, %v2814_v24  ;;  %vm808_vm11 = vcmp.lt.s32.totalorder %v773_v29, %v2816_v25 }
  0x91   :  { %v420_v60 = vpack.c.bf16 %v2853_v36, %v2858_v37 }
  0x92   :  { %v252_v10 = vpop.permute.xlu1 %251  ;;  %v249_v11 = vpop.permute.xlu0 %248 }
  0x93   :  { %vm288_vm12 = vcmp.eq.s32.totalorder %v2779_v58, %v252_v10  ;;  %vm287_vm13 = vcmp.eq.s32.totalorder %v2779_v58, %v249_v11 }
  0x94   :  { %v304_v38 = vsel %vm288_vm12, 1.0, %v2525_v5  ;;  %v303_v43 = vsel %vm287_vm13, 1.0, %v2525_v5  ;;  %vm809_vm12 = vcmp.lt.s32.totalorder %v774_v30, %v2816_v25  ;;  %vm2360_vm13 = vmpackc.low %vm2899_vm8, %vm2876_vm6  ;;  %v2527_v30 = vmov 1.0|1.0  }
  0x95   :  { %v2912_v61 = vpack.c.bf16 %v304_v38, %v303_v43  ;;  %vm2948_vm5 = vmand %vm791_vm10, %vm809_vm12  ;;  %vm811_vm10 = vcmp.lt.s32.totalorder %v776_v62, %v2816_v25 }
  0x96   :  { %v356_v12 = vpop.permute.xlu1 %355  ;;  %v353_v13 = vpop.permute.xlu0 %352 }
  0x97   :  { %vm392_vm14 = vcmp.eq.s32.totalorder %v2779_v58, %v356_v12  ;;  %vm391_vm15 = vcmp.eq.s32.totalorder %v2779_v58, %v353_v13  ;;  %v777_v12 = vadd.s32 48, %v2811_v23 }
  0x98   :  { %v2886_v44 = vsel %vm392_vm14, 1.0, %v2525_v5  ;;  %v2891_v45 = vsel %vm391_vm15, 1.0, %v2525_v5  ;;  %vm2930_vm15 = vmand %vm790_vm9, %vm808_vm11  ;;  %vm792_vm11 = vcmp.ge.s32.totalorder %v775_v49, %v2814_v24 }
  0x99   :  { %v421_v63 = vpack.c.bf16 %v2886_v44, %v2891_v45  ;;  %vm2988_vm2 = vmand %vm792_vm11, %vm810_vm0  ;;  %vm3587_vm0 = vcmp.ge.s32.totalorder %v776_v62, %v2814_v24  ;;  %vm812_vm11 = vcmp.lt.s32.totalorder %v777_v12, %v2816_v25 }
  0x9a   :  { %v2794_v14 = vpop.permute.xlu1 %257  ;;  %v2796_v15 = vpop.permute.xlu0 %254 }
  0x9b   :  { %vm290_vm14 = vcmp.eq.s32.totalorder %v2779_v58, %v2794_v14  ;;  %vm289_vm1 = vcmp.eq.s32.totalorder %v2779_v58, %v2796_v15  ;;  %v778_v14 = vadd.s32 56, %v2811_v23 }
  0x9c   :  { %v306_v13 = vsel %vm290_vm14, 1.0, %v2525_v5  ;;  %v305_v22 = vsel %vm289_vm1, 1.0, %v2525_v5  ;;  %vm2364_vm14 = vmpackc.low %vm2948_vm5, %vm2930_vm15 }
  0x9d   :  { %v3068_v44 = vpack.c.bf16 %v306_v13, %v305_v22 }
  0x9e   :  { %v2798_v16 = vpop.permute.xlu1 %361  ;;  %v2800_v17 = vpop.permute.xlu0 %358 }
  0x9f   :  { %vm394_vm3 = vcmp.eq.s32.totalorder %v2779_v58, %v2798_v16  ;;  %vm393_vm4 = vcmp.eq.s32.totalorder %v2779_v58, %v2800_v17  ;;  %v780_v17 = vadd.s32 72, %v2811_v23 }
  0xa0   :  { %v409_v35 = vsel %vm393_vm4, 1.0, %v2525_v5 }
  0xa2   :  { %v2802_v18 = vpop.permute.xlu1 %263  ;;  %v2804_v19 = vpop.permute.xlu0 %260 }
  0xa3   :  { %vm292_vm9 = vcmp.eq.s32.totalorder %v2779_v58, %v2802_v18  ;;  %vm3590_vm4 = vcmp.eq.s32.totalorder %v2779_v58, %v2804_v19 }
  0xa4   :  { %v308_v36 = vsel %vm292_vm9, 1.0, %v2525_v5  ;;  %v307_v18 = vsel %vm3590_vm4, 1.0, %v2525_v5  ;;  %vm794_vm9 = vcmp.ge.s32.totalorder %v777_v12, %v2814_v24  ;;  %vm815_vm4 = vcmp.lt.s32.totalorder %v780_v17, %v2816_v25 }
  0xa6   :  { %v2806_v20 = vpop.permute.xlu1 %367  ;;  %v2808_v21 = vpop.permute.xlu0 %364 }
  0xa7   :  { %vm396_vm1 = vcmp.eq.s32.totalorder %v2779_v58, %v2806_v20  ;;  %vm395_vm12 = vcmp.eq.s32.totalorder %v2779_v58, %v2808_v21  ;;  %v781_v20 = vadd.s32 80, %v2811_v23  ;;  %v782_v21 = vadd.s32 88, %v2811_v23 }
  0xa8   :  { %v412_v19 = vsel %vm396_vm1, 1.0, %v2525_v5  ;;  %v411_v43 = vsel %vm395_vm12, 1.0, %v2525_v5  ;;  %vm797_vm1 = vcmp.ge.s32.totalorder %v780_v17, %v2814_v24 }
  0xa9   :  { %v423_v48 = vpack.c.bf16 %v412_v19, %v411_v43 }
  0xaa   :  { %v2818_v26 = vpop.permute.xlu1 %269  ;;  %v2820_v27 = vpop.permute.xlu0 %266 }
  0xae   :  { %v2863_v39 = vpop.permute.xlu1 %373  ;;  %v2865_v40 = vpop.permute.xlu0 %370 }
  0xb2   :  { %v2940_v6 = vpop.permute.xlu1 %275  ;;  %v2942_v7 = vpop.permute.xlu0 %272 }
  0xb6   :  { %v3021_v37 = vpop.permute.xlu1 %379  ;;  %v3023_v38 = vpop.permute.xlu0 %376 }
  0xb7   :  { %vm400_vm15 = vcmp.eq.s32.totalorder %v2779_v58, %v3021_v37 }
  0xdb   :  { %v106_v33 = vpop.f32.mrb[0].mxu0 }
  0xdc   :  { %v158_v34 = vpop.f32.mrb[0].mxu1  ;;  %v2109_v46 = vpop.f32.mrb[1].mxu0  ;;  %v107_v52 = vadd.f32 %v1876_v32, %v106_v33 }
  0xdd   :  { %v2115_v47 = vpop.f32.mrb[1].mxu1  ;;  %v109_v50 = vpop.f32.mrb[2].mxu0  ;;  %v159_v53 = vadd.f32 %v1879_v41, %v158_v34  ;;  %v410_v34 = vsel %vm394_vm3, 1.0, %v2525_v5  ;;  %vm3012_vm3 = vmand %vm3587_vm0, %vm811_vm10  ;;  %vm795_vm10 = vcmp.ge.s32.totalorder %v778_v14, %v2814_v24  ;;  %vm813_vm0 = vcmp.lt.s32.totalorder %v778_v14, %v2816_v25 }
  0xde   :  { %v161_v51 = vpop.f32.mrb[2].mxu1  ;;  %v110_v54 = vadd.f32 %v1876_v32, %v109_v50  ;;  %v2110_v56 = vpop.f32.mrb[3].mxu0  ;;  %v779_v32 = vadd.s32 64, %v2811_v23  ;;  %vm2368_vm12 = vmpackc.low %vm3012_vm3, %vm2988_vm2  ;;  %v422_v45 = vpack.c.bf16 %v410_v34, %v409_v35  ;;  %v3076_v47 = vpack.c.bf16 %v308_v36, %v307_v18 }
  0xdf   :  { %v162_v55 = vadd.f32 %v1879_v41, %v161_v51  ;;  %v2116_v57 = vpop.f32.mrb[3].mxu1  ;;  %v282_v50 = vpop.permute.xlu1 %281  ;;  %vm3605_vm2 = vcmp.lt.s32.totalorder %v781_v20, %v2816_v25  ;;  %vm3606_vm3 = vcmp.ge.s32.totalorder %v781_v20, %v2814_v24 }
  0xe0   :  { %v427_v0 = vpack.c.bf16 %v110_v54, %v107_v52  ;;  %vm796_vm6 = vcmp.ge.s32.totalorder %v779_v32, %v2814_v24  ;;  %vm814_vm8 = vcmp.lt.s32.totalorder %v779_v32, %v2816_v25  ;;  %v279_v51 = vpop.permute.xlu0 %278  ;;  %v784_v54 = vadd.s32 104, %v2811_v23 }
  0xe1   :  { %v550_v1 = vpack.c.bf16 %v162_v55, %v159_v53  ;;  %v783_v53 = vadd.s32 96, %v2811_v23 }
  0xe2   :  { %2123 = vmatprep.subr.bf16.mxu1 %v427_v0 }
  0xe3   :  { %2141 = vmatprep.subr.bf16.mxu0 %v550_v1  ;;  %v210_v9 = vpop.f32.mrb[4].mxu0  ;;  %2124 = vmatpush3.bf16.msra.mxu1 %v427_v0  ;;  %v386_v0 = vpop.permute.xlu1 %385 }
  0xe4   :  { %2142 = vmatpush3.bf16.msra.mxu0 %v550_v1  ;;  %v211_v10 = vadd.f32 %v1881_v2, %v210_v9  ;;  %v2121_v11 = vpop.f32.mrb[5].mxu0  ;;  %v383_v1 = vpop.permute.xlu0 %382 }
  0xe5   :  { %v213_v29 = vpop.f32.mrb[6].mxu0  ;;  %2361 = vmatprep.subr.msk.bf16.mxu0 %vm2360_vm13, %v2527_v30 }
  0xe6   :  { %v214_v15 = vadd.f32 %v1881_v2, %v213_v29  ;;  %v2122_v33 = vpop.f32.mrb[7].mxu0  ;;  %2126 = vmatmul.mubr.msk.bf16.vlgmr.msra.gmra.mrb[4].mxu1 %vm3571_vm7, %v420_v60 }
  0xe7   :  { %2144 = vmatmul.mubr.msk.bf16.vlgmr.msra.gmra.mrb[8].mxu0 %vm3571_vm7, %v2908_v59  ;;  %2129 = vmatprep.mubr.msk.bf16.mxu1 %vm3571_vm7, %v421_v63  ;;  %v3612_v63 = vmov 0 }
  0xe8   :  { %2147 = vmatprep.mubr.msk.bf16.mxu0 %vm3571_vm7, %v2912_v61  ;;  %v672_v41 = vpack.c.bf16 %v214_v15, %v211_v10  ;;  %2363 = vmatpush3.bf16.msk.msra.mxu0 %vm2360_vm13, %v2527_v30  ;;  %vm3062_vm13 = vmand %vm794_vm9, %vm812_vm11  ;;  %vm397_vm11 = vcmp.eq.s32.totalorder %v2779_v58, %v2865_v40  ;;  %v416_v40 = vsel %vm400_vm15, 1.0, %v2525_v5 }
  0xe9   :  { %2365 = vmatprep.subr.msk.bf16.mxu0 %vm2364_vm14, %v2527_v30  ;;  %vm3072_vm7 = vmand %vm795_vm10, %vm813_vm0  ;;  %v413_v60 = vsel %vm397_vm11, 1.0, %v2525_v5  ;;  %vm3610_vm11 = vcmp.lt.s32.totalorder %v782_v21, %v2816_v25 }
  0xea   :  { %2159 = vmatprep.subr.bf16.mxu1 %v672_v41  ;;  %vm3092_vm10 = vmand %vm796_vm6, %vm814_vm8  ;;  %vm398_vm8 = vcmp.eq.s32.totalorder %v2779_v58, %v2863_v39  ;;  %vm295_vm6 = vcmp.eq.s32.totalorder %v2779_v58, %v2942_v7 }
  0xeb   :  { %2160 = vmatpush3.bf16.msra.mxu1 %v672_v41  ;;  %vm3102_vm0 = vmand %vm797_vm1, %vm815_vm4  ;;  %vm3599_vm4 = vcmask 130048   ;;  %v414_v57 = vsel %vm398_vm8, 1.0, %v2525_v5  ;;  %vm3609_vm8 = vcmp.eq.s32.totalorder %v2779_v58, %v2940_v6  ;;  %v311_v39 = vsel %vm295_vm6, 1.0, %v2525_v5 }
  0xec   :  { %2367 = vmatpush3.bf16.msk.msra.mxu0 %vm2364_vm14, %v2527_v30  ;;  %vm3600_vm9 = vmmov %vm3599_vm4  ;;  %vm399_vm14 = vcmp.eq.s32.totalorder %v2779_v58, %v3023_v38  ;;  %vm800_vm6 = vcmp.ge.s32.totalorder %v783_v53, %v2814_v24  ;;  %v424_v3 = vpack.c.bf16 %v414_v57, %v413_v60 }
  0xed   :  { %2369 = vmatprep.subr.msk.bf16.mxu0 %vm2368_vm12, %v2527_v30  ;;  %vm2372_vm5 = vmpackc.low %vm3072_vm7, %vm3062_vm13  ;;  %v415_v62 = vsel %vm399_vm14, 1.0, %v2525_v5  ;;  %vm819_vm14 = vcmp.lt.s32.totalorder %v784_v54, %v2816_v25  ;;  %vm297_vm13 = vcmp.eq.s32.totalorder %v2779_v58, %v279_v51 }
  0xee   :  { %2130 = vmatmul.mubr.msk.bf16.gmra.mrb[8].mxu1 %vm3599_vm4, %v422_v45  ;;  %vm3601_vm1 = vmmov %vm3599_vm4  ;;  %v425_v7 = vpack.c.bf16 %v416_v40, %v415_v62  ;;  %v313_v11 = vsel %vm297_vm13, 1.0, %v2525_v5 }
  0xef   :  { %2148 = vmatmul.mubr.msk.bf16.gmra.mrb[12].mxu0 %vm3600_vm9, %v3068_v44  ;;  %2133 = vmatprep.mubr.msk.bf16.mxu1 %vm3601_vm1, %v423_v48  ;;  %vm3602_vm4 = vmmov %vm3601_vm1  ;;  %vm3603_vm1 = vcmp.eq.s32.totalorder %v2779_v58, %v2818_v26  ;;  %v3607_v26 = vmov 0 }
  0xf0   :  { %2151 = vmatprep.mubr.msk.bf16.mxu0 %vm3602_vm4, %v3076_v47  ;;  %2371 = vmatpush3.bf16.msk.msra.mxu0 %vm2368_vm12, %v2527_v30  ;;  %vm3572_vm9 = vmpackc.low %vm3102_vm0, %vm3092_vm10  ;;  %v310_v55 = vsel %vm3603_vm1, 1.0, %v2525_v5  ;;  %vm3604_vm4 = vcmp.eq.s32.totalorder %v2779_v58, %v2820_v27  ;;  %v312_v27 = vsel %vm3609_vm8, 1.0, %v2525_v5  ;;  %vm3611_vm1 = vcmp.ge.s32.totalorder %v782_v21, %v2814_v24 }
  0xf1   :  { %v309_v56 = vsel %vm3604_vm4, 1.0, %v2525_v5  ;;  %2373 = vmatprep.subr.msk.bf16.mxu0 %vm2372_vm5, %v2527_v30  ;;  %vm3170_vm12 = vmand %vm3606_vm3, %vm3605_vm2  ;;  %vm818_vm2 = vcmp.lt.s32.totalorder %v783_v53, %v2816_v25  ;;  %v321_v6 = vpack.c.bf16 %v312_v27, %v311_v39  ;;  %vm298_vm3 = vcmp.eq.s32.totalorder %v2779_v58, %v282_v50 }
  0xf2   :  { %v3608_v26 = vsel %vm3170_vm12, 4294967295, %v3607_v26  ;;  %vm3194_vm4 = vmand %vm3611_vm1, %vm3610_vm11  ;;  %v320_v2 = vpack.c.bf16 %v310_v55, %v309_v56  ;;  %vm401_vm8 = vcmp.eq.s32.totalorder %v2779_v58, %v383_v1  ;;  %vm3614_vm11 = vcmask 130048  }
  0xf3   :  { %v3613_v63 = vsel %vm3194_vm4, 4294967295, %v3612_v63  ;;  %vm3615_vm1 = vmmov %vm3614_vm11  ;;  %vm3620_vm12 = vcmp.ge.s32.totalorder %v784_v54, %v2814_v24  ;;  %v314_v10 = vsel %vm298_vm3, 1.0, %v2525_v5  ;;  %v417_v13 = vsel %vm401_vm8, 1.0, %v2525_v5 }
  0xf4   :  { %2375 = vmatpush3.bf16.msk.msra.mxu0 %vm2372_vm5, %v2527_v30  ;;  %vm402_vm5 = vcmp.eq.s32.totalorder %v2779_v58, %v386_v0  ;;  %vm3618_vm15 = vmmov %vm3615_vm1  ;;  %v322_v22 = vpack.c.bf16 %v314_v10, %v313_v11 }
  0xf5   :  { %2377 = vmatprep.subr.msk.bf16.mxu0 %vm3572_vm9, %v2527_v30  ;;  %vm3228_vm9 = vmand %vm800_vm6, %vm818_vm2  ;;  %v418_v12 = vsel %vm402_vm5, 1.0, %v2525_v5  ;;  %vm3625_vm6 = vnez %v3608_v26 }
  0xf6   :  { %2134 = vmatmul.mubr.msk.bf16.gmra.mrb[12].mxu1 %vm3614_vm11, %v424_v3  ;;  %vm3619_vm7 = vmmov %vm3615_vm1  ;;  %v426_v29 = vpack.c.bf16 %v418_v12, %v417_v13 }
  0xf7   :  { %2152 = vmatmul.mubr.msk.bf16.gmra.mrb[16].mxu0 %vm3615_vm1, %v320_v2  ;;  %2137 = vmatprep.mubr.msk.bf16.mxu1 %vm3618_vm15, %v425_v7  ;;  %vm3236_vm4 = vmand %vm3620_vm12, %vm819_vm14  ;;  %vm3624_vm12 = vnez %v3613_v63 }
  0xf8   :  { %2155 = vmatprep.mubr.msk.bf16.mxu0 %vm3619_vm7, %v321_v6  ;;  %vm3623_vm11 = vmpackc.low %vm3102_vm0, %vm3092_vm10 }
  0xf9   :  { %2379 = vmatpush3.bf16.msk.msra.mxu0 %vm3623_vm11, %v2527_v30  ;;  %vm3626_vm2 = vmpackc.low %vm3624_vm12, %vm3625_vm6  ;;  %vm3637_vm11 = vmmov 0  }
  0xfa   :  { %2381 = vmatprep.subr.msk.bf16.mxu0 %vm3626_vm2, %v2527_v30  ;;  %vm2384_vm10 = vmpackc.low %vm3236_vm4, %vm3228_vm9 }
  0xfb   :  { %vm3627_vm0 = vmmov %vm3626_vm2 }
  0xfc   :  { %vm3628_vm15 = vmmov %vm3615_vm1 }
  0xfd   :  { %2383 = vmatpush3.bf16.msk.msra.mxu0 %vm3627_vm0, %v2527_v30  ;;  %vm3629_vm14 = vmmov %vm3615_vm1 }
  0xfe   :  { %2385 = vmatprep.subr.msk.bf16.mxu0 %vm2384_vm10, %v2527_v30  ;;  %2138 = vmatmul.mubr.msk.bf16.gmra.mrb[16].mxu1 %vm3628_vm15, %v426_v29  ;;  %vm3630_vm3 = vmmov %vm3615_vm1 }
  0xff   :  { %2156 = vmatmul.mubr.msk.bf16.gmra.mrb[20].mxu0 %vm3629_vm14, %v322_v22  ;;  %2161 = vmatprep.mubr.msk.bf16.mxu1 %vm3630_vm3, %v2789_v4  ;;  %vm3631_vm9 = vmmov %vm3615_vm1  ;;  %v785_v4 = vadd.s32 112, %v2811_v23 }
 0x100   :  { %vm3632_vm4 = vmmov %vm3615_vm1 }
 0x101   :  { %2387 = vmatpush3.bf16.msk.msra.mxu0 %vm2384_vm10, %v2527_v30  ;;  %vm3633_vm7 = vmmov %vm3615_vm1  ;;  %vm802_vm12 = vcmp.ge.s32.totalorder %v785_v4, %v2814_v24  ;;  %vm820_vm2 = vcmp.lt.s32.totalorder %v785_v4, %v2816_v25 }
 0x102   :  { %vm3634_vm13 = vmmov %vm3615_vm1 }
 0x103   :  { %vm3635_vm5 = vmmov %vm3615_vm1 }
 0x104   :  { %vm3636_vm8 = vmmov %vm3615_vm1 }
 0x105   :  { %vm836_vm0 = vmand %vm802_vm12, %vm820_vm2  ;;  %vm1285_vm12 = vcmask 1041408  }
 0x106   :  { %2162 = vmatmul.mubr.msk.bf16.vlgmr.msra.gmra.mrb[20].mxu1 %vm3631_vm9, %v2908_v59  ;;  %v786_v59 = vadd.s32 120, %v2811_v23 }
 0x107   :  { %2165 = vmatprep.mubr.msk.bf16.mxu1 %vm3632_vm4, %v2912_v61  ;;  %vm1236_vm4 = vcmask 15360  }
 0x108   :  { %vm803_vm6 = vcmp.ge.s32.totalorder %v786_v59, %v2814_v24  ;;  %vm821_vm10 = vcmp.lt.s32.totalorder %v786_v59, %v2816_v25 }
 0x109   :  { %vm837_vm15 = vmand %vm803_vm6, %vm821_vm10 }
 0x10a   :  { %vm2388_vm14 = vmpackc.low %vm837_vm15, %vm836_vm0 }
 0x10b   :  { %2389 = vmatprep.subr.msk.bf16.mxu0 %vm2388_vm14, %v2527_v30 }
 0x10c   :  { %2391 = vmatpush3.bf16.msk.msra.mxu0 %vm2388_vm14, %v2527_v30 }
 0x10e   :  { %2166 = vmatmul.mubr.msk.bf16.gmra.mrb[24].mxu1 %vm3633_vm7, %v3068_v44 }
 0x10f   :  { %2169 = vmatprep.mubr.msk.bf16.mxu1 %vm3634_vm13, %v3076_v47 }
 0x116   :  { %2170 = vmatmul.mubr.msk.bf16.gmra.mrb[28].mxu1 %vm3635_vm5, %v320_v2 }
 0x117   :  { %2173 = vmatprep.mubr.msk.bf16.mxu1 %vm3636_vm8, %v321_v6  ;;  %vm3638_vm8 = vcmask 1043456  }
 0x11e   :  { %2174 = vmatmul.mubr.msk.bf16.gmra.mrb[32].mxu1 %vm3615_vm1, %v322_v22  ;;  %vm3639_vm1 = vmmov %vm3638_vm8 }
 0x11f   :  { %2265 = vmatprep.mubr.msk.f32.mxu1 %vm3637_vm11, %v2525_v5 }
 0x1b9   :  { %v2127_v61 = vpop.f32.mrb[4].mxu1 }
 0x1ba   :  { %v2145_v14 = vpop.f32.mrb[8].mxu0  ;;  %v487_v31 = vpop.f32.mrb[5].mxu1 }
 0x1bb   :  { %v856_v15 = vmul.f32 %v2145_v14, %v2127_v61  ;;  %v609_v32 = vpop.f32.mrb[9].mxu0  ;;  %v2128_v34 = vpop.f32.mrb[6].mxu1 }
 0x1bc   :  { %v854_v33 = vmul.f32 %v609_v32, %v487_v31  ;;  %v2146_v35 = vpop.f32.mrb[10].mxu0  ;;  %v490_v36 = vpop.f32.mrb[7].mxu1 }
 0x1bd   :  { %v857_v24 = vmul.f32 %v2146_v35, %v2128_v34  ;;  %v612_v16 = vpop.f32.mrb[11].mxu0 }
 0x1be   :  { %v855_v17 = vmul.f32 %v612_v16, %v490_v36  ;;  %2209 = vmatprep.mubr.f32.mxu0 %v854_v33  ;;  %v2528_v33 = vmov 0.0|0.0  }
 0x1bf   :  { %2392 = vmatprep.subr.bf16.mxu1 %v2528_v33 }
 0x1c0   :  { %2210 = vmatmul.mubr.f32.vlgmr.msra.gmra.mrb[24].mxu0 %v855_v17 }
 0x1c1   :  { %2212 = vmatprep.mubr.f32.mxu0 %v856_v15  ;;  %v2131_v25 = vpop.f32.mrb[8].mxu1 }
 0x1c2   :  { %v2149_v18 = vpop.f32.mrb[12].mxu0  ;;  %v503_v38 = vpop.f32.mrb[9].mxu1 }
 0x1c3   :  { %v860_v37 = vmul.f32 %v2149_v18, %v2131_v25  ;;  %v625_v41 = vpop.f32.mrb[13].mxu0  ;;  %v2132_v43 = vpop.f32.mrb[10].mxu1 }
 0x1c4   :  { %v858_v19 = vmul.f32 %v625_v41, %v503_v38  ;;  %v2150_v20 = vpop.f32.mrb[14].mxu0  ;;  %2213 = vmatmul.mubr.f32.gmra.mrb[26].mxu0 %v857_v24  ;;  %v506_v42 = vpop.f32.mrb[11].mxu1 }
 0x1c5   :  { %v861_v21 = vmul.f32 %v2150_v20, %v2132_v43  ;;  %v628_v44 = vpop.f32.mrb[15].mxu0 }
 0x1c6   :  { %v859_v45 = vmul.f32 %v628_v44, %v506_v42  ;;  %2215 = vmatprep.mubr.f32.mxu0 %v858_v19 }
 0x1c8   :  { %2216 = vmatmul.mubr.f32.gmra.mrb[28].mxu0 %v859_v45 }
 0x1c9   :  { %2218 = vmatprep.mubr.f32.mxu0 %v860_v37  ;;  %v2135_v46 = vpop.f32.mrb[12].mxu1 }
 0x1ca   :  { %v2153_v47 = vpop.f32.mrb[16].mxu0  ;;  %v519_v49 = vpop.f32.mrb[13].mxu1 }
 0x1cb   :  { %v864_v48 = vmul.f32 %v2153_v47, %v2135_v46  ;;  %v641_v50 = vpop.f32.mrb[17].mxu0  ;;  %v2136_v52 = vpop.f32.mrb[14].mxu1 }
 0x1cc   :  { %v862_v51 = vmul.f32 %v641_v50, %v519_v49  ;;  %v2154_v53 = vpop.f32.mrb[18].mxu0  ;;  %2219 = vmatmul.mubr.f32.gmra.mrb[30].mxu0 %v861_v21  ;;  %v522_v55 = vpop.f32.mrb[15].mxu1 }
 0x1cd   :  { %v865_v54 = vmul.f32 %v2154_v53, %v2136_v52  ;;  %v644_v56 = vpop.f32.mrb[19].mxu0 }
 0x1ce   :  { %v863_v57 = vmul.f32 %v644_v56, %v522_v55  ;;  %2221 = vmatprep.mubr.f32.mxu0 %v862_v51 }
 0x1d0   :  { %2222 = vmatmul.mubr.f32.gmra.mrb[32].mxu0 %v863_v57 }
 0x1d1   :  { %2224 = vmatprep.mubr.f32.mxu0 %v864_v48  ;;  %v2139_v60 = vpop.f32.mrb[16].mxu1 }
 0x1d2   :  { %v2157_v26 = vpop.f32.mrb[20].mxu0  ;;  %v535_v39 = vpop.f32.mrb[17].mxu1 }
 0x1d3   :  { %v868_v27 = vmul.f32 %v2157_v26, %v2139_v60  ;;  %v657_v40 = vpop.f32.mrb[21].mxu0  ;;  %v2140_v63 = vpop.f32.mrb[18].mxu1 }
 0x1d4   :  { %v866_v62 = vmul.f32 %v657_v40, %v535_v39  ;;  %v2158_v0 = vpop.f32.mrb[22].mxu0  ;;  %2225 = vmatmul.mubr.f32.gmra.mrb[34].mxu0 %v865_v54  ;;  %v538_v2 = vpop.f32.mrb[19].mxu1 }
 0x1d5   :  { %v869_v1 = vmul.f32 %v2158_v0, %v2140_v63  ;;  %v660_v3 = vpop.f32.mrb[23].mxu0 }
 0x1d6   :  { %v867_v6 = vmul.f32 %v660_v3, %v538_v2  ;;  %2227 = vmatprep.mubr.f32.mxu0 %v866_v62 }
 0x1d8   :  { %2228 = vmatmul.mubr.f32.gmra.mrb[36].mxu0 %v867_v6 }
 0x1d9   :  { %2230 = vmatprep.mubr.f32.mxu0 %v868_v27  ;;  %v3293_v7 = vpop.f32.mrb[20].mxu1 }
 0x1da   :  { %v3295_v8 = vpop.f32.mrb[21].mxu1 }
 0x1db   :  { %v3297_v9 = vpop.f32.mrb[22].mxu1 }
 0x1dc   :  { %2231 = vmatmul.mubr.f32.gmra.mrb[38].mxu0 %v869_v1  ;;  %v3299_v10 = vpop.f32.mrb[23].mxu1 }
 0x1e1   :  { %v3301_v11 = vpop.f32.mrb[24].mxu1 }
 0x1e2   :  { %v3303_v12 = vpop.f32.mrb[25].mxu1 }
 0x1e3   :  { %v3305_v13 = vpop.f32.mrb[26].mxu1 }
 0x1e4   :  { %v3307_v22 = vpop.f32.mrb[27].mxu1 }
 0x1e9   :  { %v3309_v29 = vpop.f32.mrb[28].mxu1 }
 0x1ea   :  { %v3311_v4 = vpop.f32.mrb[29].mxu1 }
 0x1eb   :  { %v3313_v59 = vpop.f32.mrb[30].mxu1 }
 0x1ec   :  { %v3315_v61 = vpop.f32.mrb[31].mxu1 }
 0x1f1   :  { %v3317_v14 = vpop.f32.mrb[32].mxu1 }
 0x1f2   :  { %v3319_v15 = vpop.f32.mrb[33].mxu1 }
 0x1f3   :  { %v3321_v31 = vpop.f32.mrb[34].mxu1 }
 0x1f4   :  { %v3323_v32 = vpop.f32.mrb[35].mxu1 }
 0x293   :  { %v2211_v34 = vpop.f32.mrb[24].mxu0 }
 0x294   :  { %v1016_v35 = vmul.f32 0.17677669, %v2211_v34  ;;  %v936_v24 = vpop.f32.mrb[25].mxu0 }
 0x295   :  { %v1015_v36 = vmul.f32 0.17677669, %v936_v24 }
 0x296   :  { %v1033_v16 = vmul.f32 1.442695, %v1016_v35 }
 0x297   :  { %v1031_v17 = vmul.f32 1.442695, %v1015_v36  ;;  %v2214_v25 = vpop.f32.mrb[26].mxu0 }
 0x298   :  { %2436 = vpow2.f32 %v1033_v16  ;;  %v1018_v18 = vmul.f32 0.17677669, %v2214_v25  ;;  %v946_v37 = vpop.f32.mrb[27].mxu0 }
 0x299   :  { %2438 = vpow2.f32 %v1031_v17  ;;  %v1017_v38 = vmul.f32 0.17677669, %v946_v37 }
 0x29a   :  { %v1037_v41 = vmul.f32 1.442695, %v1018_v18 }
 0x29b   :  { %v1035_v19 = vmul.f32 1.442695, %v1017_v38  ;;  %v2217_v43 = vpop.f32.mrb[28].mxu0 }
 0x29c   :  { %2440 = vpow2.f32 %v1037_v41  ;;  %v1020_v20 = vmul.f32 0.17677669, %v2217_v43  ;;  %v956_v21 = vpop.f32.mrb[29].mxu0 }
 0x29d   :  { %2442 = vpow2.f32 %v1035_v19  ;;  %v1019_v42 = vmul.f32 0.17677669, %v956_v21 }
 0x29e   :  { %v1041_v44 = vmul.f32 1.442695, %v1020_v20 }
 0x29f   :  { %v1039_v45 = vmul.f32 1.442695, %v1019_v42  ;;  %v2220_v46 = vpop.f32.mrb[30].mxu0 }
 0x2a0   :  { %2444 = vpow2.f32 %v1041_v44  ;;  %v1022_v47 = vmul.f32 0.17677669, %v2220_v46  ;;  %v966_v48 = vpop.f32.mrb[31].mxu0 }
 0x2a1   :  { %2446 = vpow2.f32 %v1039_v45  ;;  %v1021_v49 = vmul.f32 0.17677669, %v966_v48 }
 0x2a2   :  { %v3326_v50 = vpop.eup %2436  ;;  %v1045_v51 = vmul.f32 1.442695, %v1022_v47 }
 0x2a3   :  { %v3328_v52 = vpop.eup %2438  ;;  %v1043_v53 = vmul.f32 1.442695, %v1021_v49  ;;  %v2223_v54 = vpop.f32.mrb[32].mxu0 }
 0x2a4   :  { %2448 = vpow2.f32 %v1045_v51  ;;  %v1024_v55 = vmul.f32 0.17677669, %v2223_v54  ;;  %v976_v56 = vpop.f32.mrb[33].mxu0  ;;  %v2393_v57 = vpack.c.bf16 %v3326_v50, %v3328_v52 }
 0x2a5   :  { %2450 = vpow2.f32 %v1043_v53  ;;  %v1023_v60 = vmul.f32 0.17677669, %v976_v56 }
 0x2a6   :  { %v3332_v26 = vpop.eup %2440  ;;  %v1049_v27 = vmul.f32 1.442695, %v1024_v55  ;;  %2394 = vmatpush3.bf16.msra.mxu1 %v2393_v57 }
 0x2a7   :  { %v3334_v39 = vpop.eup %2442  ;;  %v1047_v40 = vmul.f32 1.442695, %v1023_v60  ;;  %v2226_v62 = vpop.f32.mrb[34].mxu0  ;;  %2395 = vmatprep.subr.bf16.mxu1 %v2528_v33 }
 0x2a8   :  { %2452 = vpow2.f32 %v1049_v27  ;;  %v1026_v63 = vmul.f32 0.17677669, %v2226_v62  ;;  %v986_v0 = vpop.f32.mrb[35].mxu0  ;;  %v2396_v1 = vpack.c.bf16 %v3332_v26, %v3334_v39  ;;  %v1088_v27 = vpop.permute.xlu0 %1087 }
 0x2a9   :  { %2454 = vpow2.f32 %v1047_v40  ;;  %v1025_v2 = vmul.f32 0.17677669, %v986_v0  ;;  %v1923_v40 = vld [vmem:[%s3558_s5] ss:$0 sm:$0xff]  ;;  %vm1134_vm3 = vcmp.eq.s32.totalorder %v2779_v58, %v1088_v27  ;;  %v2529_v0 = vmov 1.0  }
 0x2aa   :  { %v3339_v3 = vpop.eup %2444  ;;  %v1053_v6 = vmul.f32 1.442695, %v1026_v63  ;;  %2397 = vmatpush3.bf16.msra.mxu1 %v2396_v1  ;;  %vm1068_vm9 = vcmp.eq.s32.totalorder %v2811_v23, %v1923_v40  ;;  %v1150_v63 = vsel %vm1134_vm3, 1.0, %v2525_v5  ;;  %v1468_v1 = vadd.s32 1, %v2811_v23 }
 0x2ab   :  { %v3341_v34 = vpop.eup %2446  ;;  %v1051_v35 = vmul.f32 1.442695, %v1025_v2  ;;  %v2229_v24 = vpop.f32.mrb[36].mxu0  ;;  %2398 = vmatprep.subr.bf16.mxu1 %v2528_v33 }
 0x2ac   :  { %2456 = vpow2.f32 %v1053_v6  ;;  %v1028_v36 = vmul.f32 0.17677669, %v2229_v24  ;;  %v996_v16 = vpop.f32.mrb[37].mxu0  ;;  %v2399_v17 = vpack.c.bf16 %v3339_v3, %v3341_v34  ;;  %v1469_v2 = vmul.u32 32, %v1468_v1  ;;  %v1094_v24 = vpop.permute.xlu0 %1093 }
 0x2ad   :  { %2458 = vpow2.f32 %v1051_v35  ;;  %v1027_v25 = vmul.f32 0.17677669, %v996_v16  ;;  %v1091_v35 = vpop.permute.xlu1 %1090  ;;  %vm1136_vm2 = vcmp.eq.s32.totalorder %v2779_v58, %v1094_v24 }
 0x2ae   :  { %v3346_v18 = vpop.eup %2448  ;;  %v1057_v37 = vmul.f32 1.442695, %v1028_v36  ;;  %2400 = vmatpush3.bf16.msra.mxu1 %v2399_v17  ;;  %vm1470_vm13 = vcmp.lt.s32.totalorder %v2779_v58, %v1469_v2  ;;  %vm1135_vm6 = vcmp.eq.s32.totalorder %v2779_v58, %v1091_v35 }
 0x2af   :  { %v3348_v38 = vpop.eup %2450  ;;  %v1055_v41 = vmul.f32 1.442695, %v1027_v25  ;;  %v2232_v19 = vpop.f32.mrb[38].mxu0  ;;  %2401 = vmatprep.subr.bf16.mxu1 %v2528_v33 }
 0x2b0   :  { %2460 = vpow2.f32 %v1057_v37  ;;  %v1030_v43 = vmul.f32 0.17677669, %v2232_v19  ;;  %v1006_v20 = vpop.f32.mrb[39].mxu0  ;;  %v2402_v21 = vpack.c.bf16 %v3346_v18, %v3348_v38  ;;  %v1100_v16 = vpop.permute.xlu0 %1099 }
 0x2b1   :  { %2462 = vpow2.f32 %v1055_v41  ;;  %v1029_v42 = vmul.f32 0.17677669, %v1006_v20  ;;  %v1097_v36 = vpop.permute.xlu1 %1096  ;;  %v1152_v20 = vsel %vm1136_vm2, 1.0, %v2525_v5  ;;  %vm1138_vm0 = vcmp.eq.s32.totalorder %v2779_v58, %v1100_v16 }
 0x2b2   :  { %v3353_v44 = vpop.eup %2452  ;;  %v1061_v45 = vmul.f32 1.442695, %v1030_v43  ;;  %2403 = vmatpush3.bf16.msra.mxu1 %v2402_v21  ;;  %v1151_v43 = vsel %vm1135_vm6, 1.0, %v2525_v5  ;;  %vm1137_vm10 = vcmp.eq.s32.totalorder %v2779_v58, %v1097_v36 }
 0x2b3   :  { %v3355_v46 = vpop.eup %2454  ;;  %v1059_v47 = vmul.f32 1.442695, %v1029_v42  ;;  %2404 = vmatprep.subr.bf16.mxu1 %v2528_v33  ;;  %v1153_v42 = vsel %vm1137_vm10, 1.0, %v2525_v5 }
 0x2b4   :  { %2464 = vpow2.f32 %v1061_v45  ;;  %v2405_v48 = vpack.c.bf16 %v3353_v44, %v3355_v46  ;;  %v1106_v25 = vpop.permute.xlu0 %1105 }
 0x2b5   :  { %2466 = vpow2.f32 %v1059_v47  ;;  %v1103_v17 = vpop.permute.xlu1 %1102  ;;  %v1154_v47 = vsel %vm1138_vm0, 1.0, %v2525_v5  ;;  %vm1140_vm14 = vcmp.eq.s32.totalorder %v2779_v58, %v1106_v25 }
 0x2b6   :  { %v3360_v49 = vpop.eup %2456  ;;  %2406 = vmatpush3.bf16.msra.mxu1 %v2405_v48  ;;  %vm1139_vm15 = vcmp.eq.s32.totalorder %v2779_v58, %v1103_v17 }
 0x2b7   :  { %v3362_v51 = vpop.eup %2458  ;;  %2407 = vmatprep.subr.bf16.mxu1 %v2528_v33 }
 0x2b8   :  { %v2408_v53 = vpack.c.bf16 %v3360_v49, %v3362_v51  ;;  %v1112_v21 = vpop.permute.xlu0 %1111 }
 0x2b9   :  { %v1109_v37 = vpop.permute.xlu1 %1108 }
 0x2ba   :  { %v3367_v54 = vpop.eup %2460  ;;  %2409 = vmatpush3.bf16.msra.mxu1 %v2408_v53  ;;  %v1155_v53 = vsel %vm1139_vm15, 1.0, %v2525_v5  ;;  %vm1141_vm3 = vcmp.eq.s32.totalorder %v2779_v58, %v1109_v37 }
 0x2bb   :  { %v3369_v55 = vpop.eup %2462  ;;  %2410 = vmatprep.subr.bf16.mxu1 %v2528_v33  ;;  %v1157_v40 = vsel %vm1141_vm3, 1.0, %v2525_v5 }
 0x2bc   :  { %v2411_v56 = vpack.c.bf16 %v3367_v54, %v3369_v55  ;;  %v1118_v48 = vpop.permute.xlu0 %1117 }
 0x2bd   :  { %v1115_v45 = vpop.permute.xlu1 %1114 }
 0x2be   :  { %v3374_v57 = vpop.eup %2464  ;;  %2412 = vmatpush3.bf16.msra.mxu1 %v2411_v56  ;;  %v1156_v56 = vsel %vm1140_vm14, 1.0, %v2525_v5 }
 0x2bf   :  { %v3376_v60 = vpop.eup %2466  ;;  %2413 = vmatprep.subr.bf16.mxu1 %v2528_v33  ;;  %v1466_v33 = vmul.u32 32, %v2811_v23 }
 0x2c0   :  { %v2414_v62 = vpack.c.bf16 %v3374_v57, %v3376_v60 }
 0x2c1   :  { %vm1467_vm7 = vcmp.ge.s32.totalorder %v2779_v58, %v1466_v33  ;;  %v1121_v27 = vpop.permute.xlu1 %1120 }
 0x2c2   :  { %2415 = vmatpush3.bf16.msra.mxu1 %v2414_v62  ;;  %vm1471_vm5 = vmand %vm1467_vm7, %vm1470_vm13  ;;  %vm1143_vm7 = vcmp.eq.s32.totalorder %v2779_v58, %v1115_v45  ;;  %vm1144_vm13 = vcmp.eq.s32.totalorder %v2779_v58, %v1118_v48 }
 0x2c3   :  { %v1472_v6 = vsel %vm1471_vm5, 1.0, %v2525_v5  ;;  %vm1145_vm5 = vcmp.eq.s32.totalorder %v2779_v58, %v1121_v27  ;;  %v1160_v1 = vsel %vm1144_vm13, 1.0, %v2525_v5 }
 0x2c4   :  { %2294 = vmatprep.subr.msk.mxu0 %vm3638_vm8, %v1472_v6 }
 0x2c5   :  { %2266 = vmatmul.mubr.msk.f32.vlgmr.msra.gmra.mrb[36].mxu1 %vm1068_vm9, %v2529_v0  ;;  %2295 = vmatpush3.msk.msra.mxu0 %vm3639_vm1, %v1472_v6  ;;  %vm1142_vm9 = vcmp.eq.s32.totalorder %v2779_v58, %v1112_v21  ;;  %v1159_v0 = vsel %vm1143_vm7, 1.0, %v2525_v5  ;;  %v1127_v33 = vpop.permute.xlu1 %1126  ;;  %v1161_v6 = vsel %vm1145_vm5, 1.0, %v2525_v5 }
 0x2c6   :  { %2270 = vmatprep.mubr.msk.f32.mxu1 %vm1236_vm4, %v1150_v63  ;;  %2340 = vmatprep.subr.bf16.mxu0 %v2525_v5  ;;  %v1158_v62 = vsel %vm1142_vm9, 1.0, %v2525_v5  ;;  %v1124_v63 = vpop.permute.xlu0 %1123  ;;  %vm1147_vm1 = vcmp.eq.s32.totalorder %v2779_v58, %v1127_v33 }
 0x2c7   :  { %vm1146_vm8 = vcmp.eq.s32.totalorder %v2779_v58, %v1124_v63  ;;  %v1163_v36 = vsel %vm1147_vm1, 1.0, %v2525_v5 }
 0x2c8   :  { %v1162_v35 = vsel %vm1146_vm8, 1.0, %v2525_v5 }
 0x2c9   :  { %v1133_v24 = vpop.permute.xlu1 %1132 }
 0x2ca   :  { %v1130_v2 = vpop.permute.xlu0 %1129  ;;  %vm1149_vm6 = vcmp.eq.s32.totalorder %v2779_v58, %v1133_v24 }
 0x2cb   :  { %v1165_v17 = vsel %vm1149_vm6, 1.0, %v2525_v5 }
 0x398   :  { %v1232_v41 = vpop.f32.mrb[36].mxu1 }
 0x399   :  { %2268 = vmatprep.subr.msk.mxu1 %vm1285_vm12, %v1232_v41  ;;  %v2267_v19 = vpop.f32.mrb[37].mxu1 }
 0x39a   :  { %2269 = vmatpush3.msk.msra.mxu1 %vm1285_vm12, %v1232_v41  ;;  %vm1148_vm12 = vcmp.eq.s32.totalorder %v2779_v58, %v1130_v2 }
 0x39b   :  { %2271 = vmatmul.mubr.msk.f32.vlgmr.msra.gmra.mrb[38].mxu1 %vm1236_vm4, %v1151_v43  ;;  %2320 = vmatprep.subr.bf16.mxu1 %v2525_v5  ;;  %v1164_v16 = vsel %vm1148_vm12, 1.0, %v2525_v5 }
 0x39c   :  { %2273 = vmatprep.mubr.msk.f32.mxu1 %vm1236_vm4, %v1152_v20 }
 0x39f   :  { %2274 = vmatmul.mubr.msk.f32.gmra.mrb[40].mxu1 %vm1236_vm4, %v1153_v42 }
 0x3a0   :  { %2276 = vmatprep.mubr.msk.f32.mxu1 %vm1236_vm4, %v1154_v47 }
 0x3a3   :  { %2277 = vmatmul.mubr.msk.f32.gmra.mrb[42].mxu1 %vm1236_vm4, %v1155_v53 }
 0x3a4   :  { %2279 = vmatprep.mubr.msk.f32.mxu1 %vm1236_vm4, %v1156_v56 }
 0x3a7   :  { %2280 = vmatmul.mubr.msk.f32.gmra.mrb[44].mxu1 %vm1236_vm4, %v1157_v40 }
 0x3a8   :  { %2282 = vmatprep.mubr.msk.f32.mxu1 %vm1236_vm4, %v1158_v62 }
 0x3ab   :  { %2283 = vmatmul.mubr.msk.f32.gmra.mrb[46].mxu1 %vm1236_vm4, %v1159_v0 }
 0x3ac   :  { %2285 = vmatprep.mubr.msk.f32.mxu1 %vm1236_vm4, %v1160_v1 }
 0x3af   :  { %2286 = vmatmul.mubr.msk.f32.gmra.mrb[48].mxu1 %vm1236_vm4, %v1161_v6 }
 0x3b0   :  { %2288 = vmatprep.mubr.msk.f32.mxu1 %vm1236_vm4, %v1162_v35 }
 0x3b3   :  { %2289 = vmatmul.mubr.msk.f32.gmra.mrb[50].mxu1 %vm1236_vm4, %v1163_v36 }
 0x3b4   :  { %2291 = vmatprep.mubr.msk.f32.mxu1 %vm1236_vm4, %v1164_v16 }
 0x3b7   :  { %2292 = vmatmul.mubr.msk.f32.gmra.mrb[52].mxu1 %vm1236_vm4, %v1165_v17  ;;  %vm1473_vm4 = vcmask 31744  }
 0x3b8   :  { %2336 = vmatprep.mubr.msk.bf16.mxu1 %vm3637_vm11, %v2525_v5 }
 0x46e   :  { %v2272_v25 = vpop.f32.mrb[38].mxu1 }
 0x46f   :  { %v1361_v37 = vadd.f32 1e-06, %v2272_v25  ;;  %v1355_v41 = vpop.f32.mrb[39].mxu1 }
 0x470   :  { %v1356_v19 = vadd.f32 1e-06, %v1355_v41 }
 0x471   :  { %2468 = vrcp.f32 %v1361_v37 }
 0x472   :  { %2470 = vrcp.f32 %v1356_v19  ;;  %v2275_v58 = vpop.f32.mrb[40].mxu1 }
 0x473   :  { %v1371_v43 = vadd.f32 1e-06, %v2275_v58  ;;  %v1365_v20 = vpop.f32.mrb[41].mxu1 }
 0x474   :  { %v1366_v21 = vadd.f32 1e-06, %v1365_v20 }
 0x475   :  { %2472 = vrcp.f32 %v1371_v43 }
 0x476   :  { %2474 = vrcp.f32 %v1366_v21  ;;  %v2278_v42 = vpop.f32.mrb[42].mxu1 }
 0x477   :  { %v1381_v45 = vadd.f32 1e-06, %v2278_v42  ;;  %v1375_v47 = vpop.f32.mrb[43].mxu1 }
 0x478   :  { %v1376_v48 = vadd.f32 1e-06, %v1375_v47 }
 0x479   :  { %2476 = vrcp.f32 %v1381_v45 }
 0x47a   :  { %2478 = vrcp.f32 %v1376_v48  ;;  %v2281_v53 = vpop.f32.mrb[44].mxu1 }
 0x47b   :  { %v2469_v56 = vpop.eup %2468  ;;  %v1391_v27 = vadd.f32 1e-06, %v2281_v53  ;;  %v1385_v40 = vpop.f32.mrb[45].mxu1 }
 0x47c   :  { %v2471_v62 = vpop.eup %2470  ;;  %v1386_v63 = vadd.f32 1e-06, %v1385_v40  ;;  %v1437_v33 = vmul.f32 %v2469_v56, %v3326_v50 }
 0x47d   :  { %2480 = vrcp.f32 %v1391_v27  ;;  %v1435_v0 = vmul.f32 %v2471_v62, %v3328_v52 }
 0x47e   :  { %2482 = vrcp.f32 %v1386_v63  ;;  %v2284_v1 = vpop.f32.mrb[46].mxu1 }
 0x47f   :  { %v2473_v2 = vpop.eup %2472  ;;  %v1401_v6 = vadd.f32 1e-06, %v2284_v1  ;;  %v1395_v35 = vpop.f32.mrb[47].mxu1  ;;  %2296 = vmatprep.mubr.msk.f32.mxu0 %vm1473_vm4, %v1435_v0 }
 0x480   :  { %v2475_v24 = vpop.eup %2474  ;;  %v1396_v36 = vadd.f32 1e-06, %v1395_v35  ;;  %2297 = vmatmul.mubr.msk.f32.vlgmr.msra.gmra.mrb[40].mxu0 %vm1473_vm4, %v1437_v33  ;;  %v1441_v52 = vmul.f32 %v2473_v2, %v3332_v26 }
 0x481   :  { %2484 = vrcp.f32 %v1401_v6  ;;  %v1439_v16 = vmul.f32 %v2475_v24, %v3334_v39  ;;  %v2432_v24 = vld [vmem:[%s3565_s12 + $0x20] sm:$0xff]  }
 0x482   :  { %2486 = vrcp.f32 %v1396_v36  ;;  %v2287_v17 = vpop.f32.mrb[48].mxu1  ;;  %v2433_v36 = vld [vmem:[%s3565_s12 + $0x28] sm:$0xff]  }
 0x483   :  { %v2477_v25 = vpop.eup %2476  ;;  %v1411_v50 = vadd.f32 1e-06, %v2287_v17  ;;  %v1405_v37 = vpop.f32.mrb[49].mxu1  ;;  %2299 = vmatprep.mubr.msk.f32.mxu0 %vm1473_vm4, %v1439_v16  ;;  %v2434_v16 = vld [vmem:[%s3565_s12 + $0x30] sm:$0xff]  }
 0x484   :  { %v2479_v41 = vpop.eup %2478  ;;  %v1406_v19 = vadd.f32 1e-06, %v1405_v37  ;;  %2300 = vmatmul.mubr.msk.f32.gmra.mrb[42].mxu0 %vm1473_vm4, %v1441_v52  ;;  %v1445_v39 = vmul.f32 %v2477_v25, %v3339_v3 }
 0x485   :  { %2488 = vrcp.f32 %v1411_v50  ;;  %v1443_v58 = vmul.f32 %v2479_v41, %v3341_v34 }
 0x486   :  { %2490 = vrcp.f32 %v1406_v19  ;;  %v2290_v43 = vpop.f32.mrb[50].mxu1 }
 0x487   :  { %v2481_v20 = vpop.eup %2480  ;;  %v1421_v21 = vadd.f32 1e-06, %v2290_v43  ;;  %v1415_v42 = vpop.f32.mrb[51].mxu1  ;;  %2302 = vmatprep.mubr.msk.f32.mxu0 %vm1473_vm4, %v1443_v58 }
 0x488   :  { %v2483_v26 = vpop.eup %2482  ;;  %v1416_v45 = vadd.f32 1e-06, %v1415_v42  ;;  %2303 = vmatmul.mubr.msk.f32.gmra.mrb[44].mxu0 %vm1473_vm4, %v1445_v39  ;;  %v1449_v34 = vmul.f32 %v2481_v20, %v3346_v18 }
 0x489   :  { %2492 = vrcp.f32 %v1421_v21  ;;  %v1447_v47 = vmul.f32 %v2483_v26, %v3348_v38 }
 0x48a   :  { %2494 = vrcp.f32 %v1416_v45  ;;  %v2293_v48 = vpop.f32.mrb[52].mxu1 }
 0x48b   :  { %v2485_v53 = vpop.eup %2484  ;;  %v1431_v56 = vadd.f32 1e-06, %v2293_v48  ;;  %v1425_v27 = vpop.f32.mrb[53].mxu1  ;;  %2305 = vmatprep.mubr.msk.f32.mxu0 %vm1473_vm4, %v1447_v47 }
 0x48c   :  { %v2487_v3 = vpop.eup %2486  ;;  %v1426_v40 = vadd.f32 1e-06, %v1425_v27  ;;  %2306 = vmatmul.mubr.msk.f32.gmra.mrb[46].mxu0 %vm1473_vm4, %v1449_v34  ;;  %v1453_v63 = vmul.f32 %v2485_v53, %v3353_v44 }
 0x48d   :  { %2496 = vrcp.f32 %v1431_v56  ;;  %v1451_v62 = vmul.f32 %v2487_v3, %v3355_v46 }
 0x48e   :  { %2498 = vrcp.f32 %v1426_v40 }
 0x48f   :  { %v2489_v38 = vpop.eup %2488  ;;  %2308 = vmatprep.mubr.msk.f32.mxu0 %vm1473_vm4, %v1451_v62 }
 0x490   :  { %v2491_v0 = vpop.eup %2490  ;;  %2309 = vmatmul.mubr.msk.f32.gmra.mrb[48].mxu0 %vm1473_vm4, %v1453_v63  ;;  %v1457_v33 = vmul.f32 %v2489_v38, %v3360_v49 }
 0x491   :  { %v1455_v18 = vmul.f32 %v2491_v0, %v3362_v51 }
 0x493   :  { %v2493_v1 = vpop.eup %2492  ;;  %2311 = vmatprep.mubr.msk.f32.mxu0 %vm1473_vm4, %v1455_v18 }
 0x494   :  { %v2495_v2 = vpop.eup %2494  ;;  %2312 = vmatmul.mubr.msk.f32.gmra.mrb[50].mxu0 %vm1473_vm4, %v1457_v33  ;;  %v1461_v44 = vmul.f32 %v2493_v1, %v3367_v54  ;;  %v2428_v54 = vld [vmem:[%s3565_s12] sm:$0xff]  }
 0x495   :  { %v1459_v46 = vmul.f32 %v2495_v2, %v3369_v55  ;;  %2341 = vmatpush3.bf16.msra.mxu0 %v2428_v54  ;;  %v2429_v55 = vld [vmem:[%s3565_s12 + $0x8] sm:$0xff]  }
 0x496   :  { %2342 = vmatprep.subr.bf16.mxu0 %v2525_v5 }
 0x497   :  { %v2497_v6 = vpop.eup %2496  ;;  %2314 = vmatprep.mubr.msk.f32.mxu0 %vm1473_vm4, %v1459_v46 }
 0x498   :  { %v2499_v35 = vpop.eup %2498  ;;  %2315 = vmatmul.mubr.msk.f32.gmra.mrb[52].mxu0 %vm1473_vm4, %v1461_v44  ;;  %v1465_v49 = vmul.f32 %v2497_v6, %v3374_v57  ;;  %v2430_v57 = vld [vmem:[%s3565_s12 + $0x10] sm:$0xff]  }
 0x499   :  { %v1463_v51 = vmul.f32 %v2499_v35, %v3376_v60  ;;  %2343 = vmatpush3.bf16.msra.mxu0 %v2429_v55  ;;  %v2431_v60 = vld [vmem:[%s3565_s12 + $0x18] sm:$0xff]  }
 0x49a   :  { %2344 = vmatprep.subr.bf16.mxu0 %v2525_v5 }
 0x49b   :  { %2317 = vmatprep.mubr.msk.f32.mxu0 %vm1473_vm4, %v1463_v51 }
 0x49c   :  { %2318 = vmatmul.mubr.msk.f32.gmra.mrb[54].mxu0 %vm1473_vm4, %v1465_v49 }
 0x49d   :  { %2356 = vmatprep.mubr.msk.bf16.mxu0 %vm3637_vm11, %v2525_v5  ;;  %2345 = vmatpush3.bf16.msra.mxu0 %v2430_v57 }
 0x49e   :  { %2346 = vmatprep.subr.bf16.mxu0 %v2525_v5 }
 0x4a1   :  { %2347 = vmatpush3.bf16.msra.mxu0 %v2431_v60 }
 0x4a2   :  { %2348 = vmatprep.subr.bf16.mxu0 %v2525_v5 }
 0x4a5   :  { %2349 = vmatpush3.bf16.msra.mxu0 %v2432_v24 }
 0x4a6   :  { %2350 = vmatprep.subr.bf16.mxu0 %v2525_v5 }
 0x4a9   :  { %2351 = vmatpush3.bf16.msra.mxu0 %v2433_v36 }
 0x4aa   :  { %2352 = vmatprep.subr.bf16.mxu0 %v2525_v5 }
 0x4ad   :  { %2353 = vmatpush3.bf16.msra.mxu0 %v2434_v16 }
 0x4ae   :  { %2354 = vmatprep.subr.bf16.mxu0 %v2525_v5 }
 0x553   :  { %v2298_v17 = vpop.f32.mrb[40].mxu0 }
 0x554   :  { %v1671_v52 = vmul.f32 %v2298_v17, %v3299_v10  ;;  %v1591_v25 = vpop.f32.mrb[41].mxu0 }
 0x555   :  { %v1670_v50 = vmul.f32 %v1591_v25, %v3295_v8 }
 0x557   :  { %v1686_v37 = vpack.c.bf16 %v1671_v52, %v1670_v50  ;;  %v2301_v41 = vpop.f32.mrb[42].mxu0 }
 0x558   :  { %v1673_v19 = vmul.f32 %v2301_v41, %v3297_v9  ;;  %v1601_v58 = vpop.f32.mrb[43].mxu0 }
 0x559   :  { %v1672_v43 = vmul.f32 %v3293_v7, %v1601_v58  ;;  %2321 = vmatpush3.bf16.msra.mxu1 %v1686_v37 }
 0x55a   :  { %2322 = vmatprep.subr.bf16.mxu1 %v2525_v5 }
 0x55b   :  { %v1687_v39 = vpack.c.bf16 %v1673_v19, %v1672_v43  ;;  %v2304_v20 = vpop.f32.mrb[44].mxu0 }
 0x55c   :  { %v1675_v21 = vmul.f32 %v2304_v20, %v3307_v22  ;;  %v1611_v42 = vpop.f32.mrb[45].mxu0 }
 0x55d   :  { %v1674_v10 = vmul.f32 %v1611_v42, %v3303_v12  ;;  %2323 = vmatpush3.bf16.msra.mxu1 %v1687_v39 }
 0x55e   :  { %2324 = vmatprep.subr.bf16.mxu1 %v2525_v5 }
 0x55f   :  { %v1688_v8 = vpack.c.bf16 %v1675_v21, %v1674_v10  ;;  %v2307_v26 = vpop.f32.mrb[46].mxu0 }
 0x560   :  { %v1677_v9 = vmul.f32 %v2307_v26, %v3305_v13  ;;  %v1621_v45 = vpop.f32.mrb[47].mxu0 }
 0x561   :  { %v1676_v7 = vmul.f32 %v3301_v11, %v1621_v45  ;;  %2325 = vmatpush3.bf16.msra.mxu1 %v1688_v8 }
 0x562   :  { %2326 = vmatprep.subr.bf16.mxu1 %v2525_v5 }
 0x563   :  { %v1689_v47 = vpack.c.bf16 %v1677_v9, %v1676_v7  ;;  %v2310_v48 = vpop.f32.mrb[48].mxu0 }
 0x564   :  { %v1679_v22 = vmul.f32 %v2310_v48, %v3315_v61  ;;  %v1631_v34 = vpop.f32.mrb[49].mxu0 }
 0x565   :  { %v1678_v12 = vmul.f32 %v1631_v34, %v3311_v4  ;;  %2327 = vmatpush3.bf16.msra.mxu1 %v1689_v47 }
 0x566   :  { %2328 = vmatprep.subr.bf16.mxu1 %v2525_v5 }
 0x567   :  { %v1690_v53 = vpack.c.bf16 %v1679_v22, %v1678_v12  ;;  %v2313_v56 = vpop.f32.mrb[50].mxu0 }
 0x568   :  { %v1681_v13 = vmul.f32 %v2313_v56, %v3313_v59  ;;  %v1641_v27 = vpop.f32.mrb[51].mxu0  ;;  %v1959_v59 = vld [vmem:[%s3556_s3] ss:$0 sm:$0xff] }
 0x569   :  { %v1680_v11 = vmul.f32 %v3309_v29, %v1641_v27  ;;  %2329 = vmatpush3.bf16.msra.mxu1 %v1690_v53  ;;  %vm1699_vm11 = vcmp.eq.s32.totalorder %v2811_v23, %v1959_v59  ;;  %vm1700_vm2 = vcmp.eq.s32.totalorder %v2823_v28, %v1959_v59 }
 0x56a   :  { %2330 = vmatprep.subr.bf16.mxu1 %v2525_v5  ;;  %vm1960_vm10 = vmpackc.low %vm1700_vm2, %vm1699_vm11 }
 0x56b   :  { %v1691_v3 = vpack.c.bf16 %v1681_v13, %v1680_v11  ;;  %v2316_v40 = vpop.f32.mrb[52].mxu0 }
 0x56c   :  { %v1683_v61 = vmul.f32 %v2316_v40, %v3323_v32  ;;  %v1651_v62 = vpop.f32.mrb[53].mxu0  ;;  %v2435_v32 = vld [vmem:[%s3565_s12 + $0x38] sm:$0xff]   ;;  %s2500_s12 = scalar_lea.vmem %s1866_s30, 256 }
 0x56d   :  { %v1682_v4 = vmul.f32 %v1651_v62, %v3319_v15  ;;  %2331 = vmatpush3.bf16.msra.mxu1 %v1691_v3  ;;  %2355 = vmatpush3.bf16.msra.mxu0 %v2435_v32  ;;  %p2501_p0 = scmp.ne.s32.totalorder %s1866_s30, %s2500_s12  ;;  %p2506_p2 = scmp.lt.s32.totalorder %s2500_s12, %s2500_s12 }
 0x56e   :  { %2332 = vmatprep.subr.bf16.mxu1 %v2525_v5 }
 0x56f   :  { %v1692_v63 = vpack.c.bf16 %v1683_v61, %v1682_v4  ;;  %v2319_v38 = vpop.f32.mrb[54].mxu0  ;;  %p2507_p3 = por %p2506_p2, %p2505_p1 }
 0x570   :  { %v1685_v29 = vmul.f32 %v2319_v38, %v3321_v31  ;;  %v1661_v0 = vpop.f32.mrb[55].mxu0 }
 0x571   :  { %v1684_v18 = vmul.f32 %v3317_v14, %v1661_v0  ;;  %2333 = vmatpush3.bf16.msra.mxu1 %v1692_v63  ;;  %p2508_p4 = pnand %p2507_p3, %p2501_p0 }
 0x572   :  { %2334 = vmatprep.subr.bf16.mxu1 %v2525_v5  ;;  %v1962_v5 = vld [vmem:[%s3566_s13] ss:$0 sm:$0xff] }
 0x573   :  { %v1693_v15 = vpack.c.bf16 %v1685_v29, %v1684_v18 }
 0x575   :  { %2335 = vmatpush3.bf16.msra.mxu1 %v1693_v15 }
 0x578   :  { %2337 = vmatmul.mubr.msk.bf16.vlgmr.msra.gmra.mrb[56].mxu1 %vm1960_vm10, %v2527_v30 }
 0x64b   :  { %v1738_v31 = vpop.f32.mrb[56].mxu1 }
 0x64c   :  { %v2338_v33 = vpop.f32.mrb[57].mxu1 }
 0x64d   :  { %v1741_v14 = vpop.f32.mrb[58].mxu1 }
 0x64e   :  { %v1745_v1 = vpack.c.bf16 %v1741_v14, %v1738_v31  ;;  %v2339_v2 = vpop.f32.mrb[59].mxu1 }
 0x650   :  { %2357 = vmatmul.mubr.bf16.vlgmr.msra.gmra.mrb[56].mxu0 %v1745_v1 }
 0x723   :  { %v1851_v23 = vpop.f32.mrb[56].mxu0 }
 0x724   :  { %v1852_v28 = vadd.f32 %v1962_v5, %v1851_v23  ;;  %v2358_v30 = vpop.f32.mrb[57].mxu0 }
 0x725   :  { %v1854_v46 = vpop.f32.mrb[58].mxu0 }
 0x726   :  { %1858 = vst [vmem:[#allocation2] sm:$0xff] %v1852_v28  ;;  %v1855_v44 = vadd.f32 %v1962_v5, %v1854_v46  ;;  %v2359_v6 = vpop.f32.mrb[59].mxu0 }
 0x728   :  { %1859 = vst [vmem:[#allocation2 + $0x8] sm:$0xff] %v1855_v44 }
 0x729   :  { %2511 = shalt.err (!%p2508_p4)
}
 0x72a   :  { %s2512_s15 = scalar_lea.hbm %s3567_s14, 256 }
 0x72b   :  { %p2513_p5 = scmp.ne.s32.totalorder %s3567_s14, %s2512_s15  ;;  %p2516_p6 = scmp.lt.u32.totalorder %s2512_s15, %s3567_s14 }
 0x72d   :  { %p2518_p7 = pnand %p2516_p6, %p2513_p5 }
 0x72f   :  { %2521 = shalt.err (!%p2518_p7)
}
 0x730   :  { %s2531_s5 = smov 128   ;;  %s2532_s17 = smov 8  }
 0x731   :  { %1871 = dma.vmem_to_hbm [thread:$0]  %s1866_s30, 256, %s3567_s14, [#allocation3], %s2531_s5, %s2531_s5, %s2532_s17  }
 0x732   :  { %2522 = dma.done.wait [#allocation3], 256  }
 0x733   :  { %2523 = vsyncadd [#allocation3], 4294967040 }
 0x734   :  { %1875 = vsyncpa [#allocation3], 1 }

</bundles_post_ra>
